<compile_context>
chip_gen: v7x
topology: tpu7x:2x2x1
jax: 0.10.0
libtpu: 0.0.40
codegen_flags: <defaults>
</compile_context>

<pallas_src>
import math

import jax
import jax.numpy as jnp
from jax.experimental import pallas as pl
from jax.experimental.pallas import tpu as pltpu


def _cdiv(a, b):
    return (a + b - 1) // b


def _pick_vmem_limit():
    """Generation-aware scoped-VMEM limit (<= ~75% of physical, capped 96 MiB)."""
    cap = 64 * 1024 * 1024                      # conservative default (v7x per-TC)
    try:
        info_cap = int(pltpu.get_tpu_info().vmem_capacity_bytes)
        if info_cap > 0:
            cap = info_cap
    except Exception:
        pass
    return min(96 * 1024 * 1024, int(0.75 * cap))


def _upsample_conv_kernel(x_ref, w_ref, b_ref, o_ref):
    """One (batch, row-tile) grid step.

    x_ref: (1, Hp+2, W+2, Cin)   whole zero-padded NHWC image; resident across
                                 the row-tile axis (index_map constant in r)
    w_ref: (4, 4, Cin, Cp)       folded per-phase 2x2 weights (VMEM-resident)
    b_ref: (1, Cp)               bias, f32 (VMEM-resident)
    o_ref: (1, TR*W, 4*Cp)       the 4 parity phases packed on the lane axis
    """
    wcols = x_ref.shape[2] - 2
    cin = x_ref.shape[3]
    cp = o_ref.shape[2] // 4
    tr = o_ref.shape[1] // wcols
    row0 = pl.program_id(1) * tr
    bias_v = b_ref[...]                                   # (1, Cp) f32, hoisted

    for py in range(2):              # output row parity
        for px in range(2):          # output col parity
            acc = None               # f32 accumulator for this phase
            for ty in range(2):
                for tx in range(2):
                    # Overlapping row window sliced straight from the resident
                    # padded image (no HBM halo duplication).
                    tap = x_ref[0, pl.ds(row0 + py + ty, tr),
                                px + tx:px + tx + wcols, :]
                    contrib = jnp.dot(tap.reshape(tr * wcols, cin),
                                      w_ref[2 * py + px, 2 * ty + tx],
                                      preferred_element_type=jnp.float32)
                    acc = contrib if acc is None else acc + contrib
            phase = 2 * py + px
            # Direct per-phase store (no 4-phase concat temp).
            o_ref[0, :, phase * cp:(phase + 1) * cp] = (
                acc + bias_v).astype(o_ref.dtype)


def _fold_upsample_into_weights(weight, cout_pad):
    """OIHW (Cout,Cin,3,3) -> (4, 4, Cin, cout_pad) per-phase 2x2 weights (f32).

    For output parity p and 3x3 kernel index k, the tap index is
    t(p, k) = floor((p + k - 1)/2) + 1 - p  (input offset d = t + p - 1 on the
    original grid, matching the kernel's row/col slicing).
    """
    cout, cin = weight.shape[0], weight.shape[1]
    w_khkw = jnp.transpose(weight, (2, 3, 1, 0)).astype(jnp.float32)  # (3,3,ci,co)

    def fold_tap(par, k):
        return (par + k - 1) // 2 + 1 - par

    w_eff = jnp.zeros((2, 2, 2, 2, cin, cout), jnp.float32)  # (py,px,ty,tx,ci,co)
    for py in range(2):
        for px in range(2):
            for kh in range(3):
                for kw in range(3):
                    ty, tx = fold_tap(py, kh), fold_tap(px, kw)
                    w_eff = w_eff.at[py, px, ty, tx].add(w_khkw[kh, kw])
    w_eff = w_eff.reshape(4, 4, cin, cout)               # phase = 2*py+px, tap = 2*ty+tx
    if cout_pad > cout:
        w_eff = jnp.pad(w_eff, ((0, 0), (0, 0), (0, 0), (0, cout_pad - cout)))
    return w_eff


def upsample_forward(x_nchw, weight=None, bias=None, *, use_conv=True, dims=2,
                     row_tile=None, compute_dtype=jnp.bfloat16):
    """JAX/Pallas equivalent of Upsample.forward (NCHW in, NCHW out)."""
    if dims == 3:
        # TODO(synk): dims==3 with use_conv applies nn.Conv2d to a 5-D tensor in
        # the original module (ill-defined); only the nearest upsample is given.
        assert not use_conv
        return jnp.repeat(jnp.repeat(x_nchw, 2, axis=3), 2, axis=4)

    n, c, h, w = x_nchw.shape
    if not use_conv:
        # pure data replication -> no kernel value, leave as XLA glue
        return jnp.repeat(jnp.repeat(x_nchw, 2, axis=2), 2, axis=3)

    cout = weight.shape[0]
    # Pad Cout to a multiple of 32 so the phase-packed output lane dim
    # (4*cout_pad) is a multiple of 128 -> unmasked vst (no-op for real counts).
    cout_pad = _cdiv(cout, 32) * 32
    in_bytes = jnp.dtype(compute_dtype).itemsize
    out_bytes = jnp.dtype(x_nchw.dtype).itemsize

    vmem_limit = _pick_vmem_limit()
    budget = int(0.7 * vmem_limit)

    # Resident VMEM: folded weights (+2 buffers), bias, and the whole padded
    # input image per batch (kept resident across the row-tile grid axis).
    w_bytes = 2 * 4 * 4 * c * cout_pad * in_bytes
    img_bytes = 2 * (h + 10) * (w + 2) * c * in_bytes     # slack for ragged-H pad
    fixed = w_bytes + img_bytes + 4 * cout_pad * 4
    if fixed >= budget:
        # TODO(synk): for very large Cin*Cout or images add a Cout grid axis
        # (weight tiling) and/or manual halo DMA instead of a resident image.
        raise ValueError(f"resident weights+image ({fixed} B) exceed the VMEM "
                         f"budget ({budget} B); Cout tiling not implemented")

    if row_tile is None:
        per_row = w * (2 * 4 * cout_pad * out_bytes       # double-buffered out tile
                       + 4 * cout_pad * 4                 # f32 phase accumulator
                       + 2 * c * 4)                       # per-tap slice temps
        row_tile = max(1, min(h, (budget - fixed) // per_row))
        if n == 1:
            row_tile = min(row_tile, _cdiv(h, 2))         # >=2 grid steps (v7x 2 TCs)
    n_row = max(1, _cdiv(h, row_tile))
    row_tile = _cdiv(h, n_row)                            # balanced tiles; ragged H ok
    m8 = 8 // math.gcd(w, 8)
    row_tile = _cdiv(row_tile, m8) * m8                   # keep row_tile*W % 8 == 0
    h_pad = n_row * row_tile

    # --- glue at ORIGINAL resolution: NCHW->NHWC cast + single zero pad
    # (halo of 1; extra bottom rows only if H was padded to the row tile).
    x_nhwc = jnp.transpose(x_nchw, (0, 2, 3, 1)).astype(compute_dtype)
    x_pad = jnp.pad(x_nhwc, ((0, 0), (1, 1 + h_pad - h), (1, 1), (0, 0)))

    w_phase = _fold_upsample_into_weights(weight, cout_pad).astype(compute_dtype)
    b_all = jnp.pad(bias.astype(jnp.float32),
                    (0, cout_pad - cout)).reshape(1, cout_pad)

    out_flat = pl.pallas_call(
        _upsample_conv_kernel,
        out_shape=jax.ShapeDtypeStruct((n, h_pad * w, 4 * cout_pad), x_nchw.dtype),
        grid_spec=pltpu.PrefetchScalarGridSpec(
            num_scalar_prefetch=0,
            grid=(n, n_row),
            in_specs=[
                # whole padded image; constant index over r -> VMEM-resident,
                # no duplicated halo tiles in HBM
                pl.BlockSpec((1, h_pad + 2, w + 2, c), lambda b, r: (b, 0, 0, 0)),
                pl.BlockSpec((4, 4, c, cout_pad), lambda b, r: (0, 0, 0, 0)),
                pl.BlockSpec((1, cout_pad), lambda b, r: (0, 0)),
            ],
            out_specs=pl.BlockSpec((1, row_tile * w, 4 * cout_pad),
                                   lambda b, r: (b, r, 0)),
        ),
        compiler_params=pltpu.CompilerParams(
            dimension_semantics=("parallel", "parallel"),
            vmem_limit_bytes=vmem_limit,
        ),
    )(x_pad, w_phase, b_all)

    # --- epilogue: drop channel padding, pixel-shuffle the 4 phases, NHWC->NCHW.
    # TODO(synk): if the consumer accepts NHWC / phase-packed layout this full
    # HBM round trip of the 4x-sized output can be dropped.
    out6 = out_flat.reshape(n, h_pad, w, 2, 2, cout_pad)[..., :cout]
    out = jnp.transpose(out6, (0, 5, 1, 3, 2, 4)).reshape(n, cout, 2 * h_pad, 2 * w)
    return out[:, :, :2 * h, :]


if __name__ == "__main__":
    # Small deterministic example consistent with the module:
    # channels=4, use_conv=True, dims=2, x: (2, 4, 16, 16)
    N, C, H, W = 2, 4, 16, 16
    Cout = C  # out_channels defaults to channels

    key = jax.random.PRNGKey(0)
    kx, kw, kb = jax.random.split(key, 3)
    x = jax.random.normal(kx, (N, C, H, W), dtype=jnp.float32)

    # nn.Conv2d(channels, out_channels, 3, padding=1) parameter shapes,
    # deterministic kaiming-uniform-style init (synthetic, no checkpoint load).
    fan_in = C * 3 * 3
    bound = 1.0 / math.sqrt(fan_in)
    weight = jax.random.uniform(kw, (Cout, C, 3, 3), jnp.float32, -bound, bound)
    bias = jax.random.uniform(kb, (Cout,), jnp.float32, -bound, bound)

    # Pure-JAX reference (literal module semantics: nearest 2x then 3x3 conv).
    x_up = jnp.repeat(jnp.repeat(x, 2, axis=2), 2, axis=3)
    ref = jax.lax.conv_general_dilated(
        x_up, weight, (1, 1), ((1, 1), (1, 1)),
        dimension_numbers=("NCHW", "OIHW", "NCHW"),
        precision=jax.lax.Precision.HIGHEST,
    ) + bias.reshape(1, Cout, 1, 1)

    # f32 compute path, explicit row tiling (grid = (2, 2)).
    out = jax.block_until_ready(
        upsample_forward(x, weight, bias, row_tile=8, compute_dtype=jnp.float32))
    assert out.shape == (N, Cout, 2 * H, 2 * W), out.shape
    err_f32 = float(jnp.max(jnp.abs(out - ref)))
    assert err_f32 < 1e-3, f"f32 path mismatch vs reference, max abs err = {err_f32}"

    # f32 compute path with a non-divisor row tile (exercises ragged-H padding).
    out_rt = jax.block_until_ready(
        upsample_forward(x, weight, bias, row_tile=7, compute_dtype=jnp.float32))
    err_rt = float(jnp.max(jnp.abs(out_rt - ref)))
    assert err_rt < 1e-3, f"ragged-H path mismatch vs reference, max abs err = {err_rt}"

    # Default path: bf16 compute (auto tile choice), f32 MXU accumulation.
    out_bf16 = jax.block_until_ready(upsample_forward(x, weight, bias))
    err_bf16 = float(jnp.max(jnp.abs(out_bf16 - ref)))
    assert err_bf16 < 5e-2, f"bf16 path mismatch vs reference, max abs err = {err_bf16}"

    # use_conv=False path (nearest upsample only).
    out_nc = jax.block_until_ready(upsample_forward(x, use_conv=False))
    assert out_nc.shape == (N, C, 2 * H, 2 * W), out_nc.shape
    assert float(jnp.max(jnp.abs(out_nc - x_up))) == 0.0

    print("KERNEL_OK")
</pallas_src>

<mosaic_0001>
module attributes {stable_mosaic.version = 11 : i64} {
  func.func @_upsample_conv_kernel(%arg0: i32, %arg1: i32, %arg2: memref<1x18x18x4xf32, #tpu.memory_space<vmem>>, %arg3: memref<4x4x4x32xf32, #tpu.memory_space<vmem>>, %arg4: memref<1x32xf32, #tpu.memory_space<vmem>>, %arg5: memref<1x128x128xf32, #tpu.memory_space<vmem>>) attributes {dimension_semantics = [#tpu.dimension_semantics<parallel>, #tpu.dimension_semantics<parallel>], iteration_bounds = array<i64: 2, 2>, scalar_prefetch = 0 : i64, scratch_operands = 0 : i64, tpu.core_type = #tpu.core_type<tc>, window_params = [{transform_indices = @transform_0, window_bounds = array<i64: 1, 18, 18, 4>}, {pipeline_mode = #tpu.pipeline_mode<synchronous>, transform_indices = @transform_1, window_bounds = array<i64: 4, 4, 4, 32>}, {pipeline_mode = #tpu.pipeline_mode<synchronous>, transform_indices = @transform_2, window_bounds = array<i64: 1, 32>}, {transform_indices = @transform_3, window_bounds = array<i64: 1, 128, 128>}]} {
    %c8_i32 = arith.constant 8 : i32
    %0 = arith.muli %arg1, %c8_i32 : i32
    %c0 = arith.constant 0 : index
    %c0_0 = arith.constant 0 : index
    %1 = vector.load %arg4[%c0, %c0_0] : memref<1x32xf32, #tpu.memory_space<vmem>>, vector<1x32xf32>
    %c0_i32 = arith.constant 0 : i32
    %2 = arith.addi %0, %c0_i32 : i32
    %c0_i32_1 = arith.constant 0 : i32
    %3 = arith.addi %2, %c0_i32_1 : i32
    %c0_2 = arith.constant 0 : index
    %4 = arith.index_cast %3 : i32 to index
    %c0_3 = arith.constant 0 : index
    %c0_4 = arith.constant 0 : index
    %5 = vector.load %arg2[%c0_2, %4, %c0_3, %c0_4] : memref<1x18x18x4xf32, #tpu.memory_space<vmem>>, vector<1x8x16x4xf32>
    %6 = vector.shape_cast %5 : vector<1x8x16x4xf32> to vector<8x16x4xf32>
    %7 = vector.shape_cast %6 : vector<8x16x4xf32> to vector<128x4xf32>
    %c0_5 = arith.constant 0 : index
    %c0_6 = arith.constant 0 : index
    %c0_7 = arith.constant 0 : index
    %c0_8 = arith.constant 0 : index
    %8 = vector.load %arg3[%c0_5, %c0_6, %c0_7, %c0_8] : memref<4x4x4x32xf32, #tpu.memory_space<vmem>>, vector<1x1x4x32xf32>
    %9 = vector.shape_cast %8 : vector<1x1x4x32xf32> to vector<4x32xf32>
    %cst = arith.constant dense<0.000000e+00> : vector<128x32xf32>
    %10 = tpu.matmul %7, %9, %cst {dimension_numbers = #tpu.dot_dimension_numbers<[1], [0], [0], [1], [0, 0, 1, 1], [], []>} : vector<128x4xf32>, vector<4x32xf32>, vector<128x32xf32> -> vector<128x32xf32>
    %c0_i32_9 = arith.constant 0 : i32
    %11 = arith.addi %0, %c0_i32_9 : i32
    %c0_i32_10 = arith.constant 0 : i32
    %12 = arith.addi %11, %c0_i32_10 : i32
    %c0_11 = arith.constant 0 : index
    %13 = arith.index_cast %12 : i32 to index
    %c1 = arith.constant 1 : index
    %c0_12 = arith.constant 0 : index
    %14 = vector.load %arg2[%c0_11, %13, %c1, %c0_12] : memref<1x18x18x4xf32, #tpu.memory_space<vmem>>, vector<1x8x16x4xf32>
    %15 = vector.shape_cast %14 : vector<1x8x16x4xf32> to vector<8x16x4xf32>
    %16 = vector.shape_cast %15 : vector<8x16x4xf32> to vector<128x4xf32>
    %c0_13 = arith.constant 0 : index
    %c1_14 = arith.constant 1 : index
    %c0_15 = arith.constant 0 : index
    %c0_16 = arith.constant 0 : index
    %17 = vector.load %arg3[%c0_13, %c1_14, %c0_15, %c0_16] : memref<4x4x4x32xf32, #tpu.memory_space<vmem>>, vector<1x1x4x32xf32>
    %18 = vector.shape_cast %17 : vector<1x1x4x32xf32> to vector<4x32xf32>
    %cst_17 = arith.constant dense<0.000000e+00> : vector<128x32xf32>
    %19 = tpu.matmul %16, %18, %cst_17 {dimension_numbers = #tpu.dot_dimension_numbers<[1], [0], [0], [1], [0, 0, 1, 1], [], []>} : vector<128x4xf32>, vector<4x32xf32>, vector<128x32xf32> -> vector<128x32xf32>
    %20 = arith.addf %10, %19 : vector<128x32xf32>
    %c0_i32_18 = arith.constant 0 : i32
    %21 = arith.addi %0, %c0_i32_18 : i32
    %c1_i32 = arith.constant 1 : i32
    %22 = arith.addi %21, %c1_i32 : i32
    %c0_19 = arith.constant 0 : index
    %23 = arith.index_cast %22 : i32 to index
    %c0_20 = arith.constant 0 : index
    %c0_21 = arith.constant 0 : index
    %24 = vector.load %arg2[%c0_19, %23, %c0_20, %c0_21] : memref<1x18x18x4xf32, #tpu.memory_space<vmem>>, vector<1x8x16x4xf32>
    %25 = vector.shape_cast %24 : vector<1x8x16x4xf32> to vector<8x16x4xf32>
    %26 = vector.shape_cast %25 : vector<8x16x4xf32> to vector<128x4xf32>
    %c0_22 = arith.constant 0 : index
    %c2 = arith.constant 2 : index
    %c0_23 = arith.constant 0 : index
    %c0_24 = arith.constant 0 : index
    %27 = vector.load %arg3[%c0_22, %c2, %c0_23, %c0_24] : memref<4x4x4x32xf32, #tpu.memory_space<vmem>>, vector<1x1x4x32xf32>
    %28 = vector.shape_cast %27 : vector<1x1x4x32xf32> to vector<4x32xf32>
    %cst_25 = arith.constant dense<0.000000e+00> : vector<128x32xf32>
    %29 = tpu.matmul %26, %28, %cst_25 {dimension_numbers = #tpu.dot_dimension_numbers<[1], [0], [0], [1], [0, 0, 1, 1], [], []>} : vector<128x4xf32>, vector<4x32xf32>, vector<128x32xf32> -> vector<128x32xf32>
    %30 = arith.addf %20, %29 : vector<128x32xf32>
    %c0_i32_26 = arith.constant 0 : i32
    %31 = arith.addi %0, %c0_i32_26 : i32
    %c1_i32_27 = arith.constant 1 : i32
    %32 = arith.addi %31, %c1_i32_27 : i32
    %c0_28 = arith.constant 0 : index
    %33 = arith.index_cast %32 : i32 to index
    %c1_29 = arith.constant 1 : index
    %c0_30 = arith.constant 0 : index
    %34 = vector.load %arg2[%c0_28, %33, %c1_29, %c0_30] : memref<1x18x18x4xf32, #tpu.memory_space<vmem>>, vector<1x8x16x4xf32>
    %35 = vector.shape_cast %34 : vector<1x8x16x4xf32> to vector<8x16x4xf32>
    %36 = vector.shape_cast %35 : vector<8x16x4xf32> to vector<128x4xf32>
    %c0_31 = arith.constant 0 : index
    %c3 = arith.constant 3 : index
    %c0_32 = arith.constant 0 : index
    %c0_33 = arith.constant 0 : index
    %37 = vector.load %arg3[%c0_31, %c3, %c0_32, %c0_33] : memref<4x4x4x32xf32, #tpu.memory_space<vmem>>, vector<1x1x4x32xf32>
    %38 = vector.shape_cast %37 : vector<1x1x4x32xf32> to vector<4x32xf32>
    %cst_34 = arith.constant dense<0.000000e+00> : vector<128x32xf32>
    %39 = tpu.matmul %36, %38, %cst_34 {dimension_numbers = #tpu.dot_dimension_numbers<[1], [0], [0], [1], [0, 0, 1, 1], [], []>} : vector<128x4xf32>, vector<4x32xf32>, vector<128x32xf32> -> vector<128x32xf32>
    %40 = arith.addf %30, %39 : vector<128x32xf32>
    %41 = vector.broadcast %1 : vector<1x32xf32> to vector<128x32xf32>
    %42 = arith.addf %40, %41 : vector<128x32xf32>
    %c0_35 = arith.constant 0 : index
    %c0_36 = arith.constant 0 : index
    %c0_37 = arith.constant 0 : index
    %43 = vector.load %arg5[%c0_35, %c0_36, %c0_37] : memref<1x128x128xf32, #tpu.memory_space<vmem>>, vector<1x128x32xf32>
    %44 = vector.shape_cast %43 : vector<1x128x32xf32> to vector<128x32xf32>
    %45 = vector.shape_cast %42 : vector<128x32xf32> to vector<1x128x32xf32>
    tpu.vector_store %arg5[%c0_35, %c0_36, %c0_37], %45 {strides = array<i32>} : memref<1x128x128xf32, #tpu.memory_space<vmem>>, vector<1x128x32xf32>,
    %c0_i32_38 = arith.constant 0 : i32
    %46 = arith.addi %0, %c0_i32_38 : i32
    %c0_i32_39 = arith.constant 0 : i32
    %47 = arith.addi %46, %c0_i32_39 : i32
    %c0_40 = arith.constant 0 : index
    %48 = arith.index_cast %47 : i32 to index
    %c1_41 = arith.constant 1 : index
    %c0_42 = arith.constant 0 : index
    %49 = vector.load %arg2[%c0_40, %48, %c1_41, %c0_42] : memref<1x18x18x4xf32, #tpu.memory_space<vmem>>, vector<1x8x16x4xf32>
    %50 = vector.shape_cast %49 : vector<1x8x16x4xf32> to vector<8x16x4xf32>
    %51 = vector.shape_cast %50 : vector<8x16x4xf32> to vector<128x4xf32>
    %c1_43 = arith.constant 1 : index
    %c0_44 = arith.constant 0 : index
    %c0_45 = arith.constant 0 : index
    %c0_46 = arith.constant 0 : index
    %52 = vector.load %arg3[%c1_43, %c0_44, %c0_45, %c0_46] : memref<4x4x4x32xf32, #tpu.memory_space<vmem>>, vector<1x1x4x32xf32>
    %53 = vector.shape_cast %52 : vector<1x1x4x32xf32> to vector<4x32xf32>
    %cst_47 = arith.constant dense<0.000000e+00> : vector<128x32xf32>
    %54 = tpu.matmul %51, %53, %cst_47 {dimension_numbers = #tpu.dot_dimension_numbers<[1], [0], [0], [1], [0, 0, 1, 1], [], []>} : vector<128x4xf32>, vector<4x32xf32>, vector<128x32xf32> -> vector<128x32xf32>
    %c0_i32_48 = arith.constant 0 : i32
    %55 = arith.addi %0, %c0_i32_48 : i32
    %c0_i32_49 = arith.constant 0 : i32
    %56 = arith.addi %55, %c0_i32_49 : i32
    %c0_50 = arith.constant 0 : index
    %57 = arith.index_cast %56 : i32 to index
    %c2_51 = arith.constant 2 : index
    %c0_52 = arith.constant 0 : index
    %58 = vector.load %arg2[%c0_50, %57, %c2_51, %c0_52] : memref<1x18x18x4xf32, #tpu.memory_space<vmem>>, vector<1x8x16x4xf32>
    %59 = vector.shape_cast %58 : vector<1x8x16x4xf32> to vector<8x16x4xf32>
    %60 = vector.shape_cast %59 : vector<8x16x4xf32> to vector<128x4xf32>
    %c1_53 = arith.constant 1 : index
    %c1_54 = arith.constant 1 : index
    %c0_55 = arith.constant 0 : index
    %c0_56 = arith.constant 0 : index
    %61 = vector.load %arg3[%c1_53, %c1_54, %c0_55, %c0_56] : memref<4x4x4x32xf32, #tpu.memory_space<vmem>>, vector<1x1x4x32xf32>
    %62 = vector.shape_cast %61 : vector<1x1x4x32xf32> to vector<4x32xf32>
    %cst_57 = arith.constant dense<0.000000e+00> : vector<128x32xf32>
    %63 = tpu.matmul %60, %62, %cst_57 {dimension_numbers = #tpu.dot_dimension_numbers<[1], [0], [0], [1], [0, 0, 1, 1], [], []>} : vector<128x4xf32>, vector<4x32xf32>, vector<128x32xf32> -> vector<128x32xf32>
    %64 = arith.addf %54, %63 : vector<128x32xf32>
    %c0_i32_58 = arith.constant 0 : i32
    %65 = arith.addi %0, %c0_i32_58 : i32
    %c1_i32_59 = arith.constant 1 : i32
    %66 = arith.addi %65, %c1_i32_59 : i32
    %c0_60 = arith.constant 0 : index
    %67 = arith.index_cast %66 : i32 to index
    %c1_61 = arith.constant 1 : index
    %c0_62 = arith.constant 0 : index
    %68 = vector.load %arg2[%c0_60, %67, %c1_61, %c0_62] : memref<1x18x18x4xf32, #tpu.memory_space<vmem>>, vector<1x8x16x4xf32>
    %69 = vector.shape_cast %68 : vector<1x8x16x4xf32> to vector<8x16x4xf32>
    %70 = vector.shape_cast %69 : vector<8x16x4xf32> to vector<128x4xf32>
    %c1_63 = arith.constant 1 : index
    %c2_64 = arith.constant 2 : index
    %c0_65 = arith.constant 0 : index
    %c0_66 = arith.constant 0 : index
    %71 = vector.load %arg3[%c1_63, %c2_64, %c0_65, %c0_66] : memref<4x4x4x32xf32, #tpu.memory_space<vmem>>, vector<1x1x4x32xf32>
    %72 = vector.shape_cast %71 : vector<1x1x4x32xf32> to vector<4x32xf32>
    %cst_67 = arith.constant dense<0.000000e+00> : vector<128x32xf32>
    %73 = tpu.matmul %70, %72, %cst_67 {dimension_numbers = #tpu.dot_dimension_numbers<[1], [0], [0], [1], [0, 0, 1, 1], [], []>} : vector<128x4xf32>, vector<4x32xf32>, vector<128x32xf32> -> vector<128x32xf32>
    %74 = arith.addf %64, %73 : vector<128x32xf32>
    %c0_i32_68 = arith.constant 0 : i32
    %75 = arith.addi %0, %c0_i32_68 : i32
    %c1_i32_69 = arith.constant 1 : i32
    %76 = arith.addi %75, %c1_i32_69 : i32
    %c0_70 = arith.constant 0 : index
    %77 = arith.index_cast %76 : i32 to index
    %c2_71 = arith.constant 2 : index
    %c0_72 = arith.constant 0 : index
    %78 = vector.load %arg2[%c0_70, %77, %c2_71, %c0_72] : memref<1x18x18x4xf32, #tpu.memory_space<vmem>>, vector<1x8x16x4xf32>
    %79 = vector.shape_cast %78 : vector<1x8x16x4xf32> to vector<8x16x4xf32>
    %80 = vector.shape_cast %79 : vector<8x16x4xf32> to vector<128x4xf32>
    %c1_73 = arith.constant 1 : index
    %c3_74 = arith.constant 3 : index
    %c0_75 = arith.constant 0 : index
    %c0_76 = arith.constant 0 : index
    %81 = vector.load %arg3[%c1_73, %c3_74, %c0_75, %c0_76] : memref<4x4x4x32xf32, #tpu.memory_space<vmem>>, vector<1x1x4x32xf32>
    %82 = vector.shape_cast %81 : vector<1x1x4x32xf32> to vector<4x32xf32>
    %cst_77 = arith.constant dense<0.000000e+00> : vector<128x32xf32>
    %83 = tpu.matmul %80, %82, %cst_77 {dimension_numbers = #tpu.dot_dimension_numbers<[1], [0], [0], [1], [0, 0, 1, 1], [], []>} : vector<128x4xf32>, vector<4x32xf32>, vector<128x32xf32> -> vector<128x32xf32>
    %84 = arith.addf %74, %83 : vector<128x32xf32>
    %85 = vector.broadcast %1 : vector<1x32xf32> to vector<128x32xf32>
    %86 = arith.addf %84, %85 : vector<128x32xf32>
    %c0_78 = arith.constant 0 : index
    %c0_79 = arith.constant 0 : index
    %c32 = arith.constant 32 : index
    %87 = vector.load %arg5[%c0_78, %c0_79, %c32] : memref<1x128x128xf32, #tpu.memory_space<vmem>>, vector<1x128x32xf32>
    %88 = vector.shape_cast %87 : vector<1x128x32xf32> to vector<128x32xf32>
    %89 = vector.shape_cast %86 : vector<128x32xf32> to vector<1x128x32xf32>
    tpu.vector_store %arg5[%c0_78, %c0_79, %c32], %89 {strides = array<i32>} : memref<1x128x128xf32, #tpu.memory_space<vmem>>, vector<1x128x32xf32>,
    %c1_i32_80 = arith.constant 1 : i32
    %90 = arith.addi %0, %c1_i32_80 : i32
    %c0_i32_81 = arith.constant 0 : i32
    %91 = arith.addi %90, %c0_i32_81 : i32
    %c0_82 = arith.constant 0 : index
    %92 = arith.index_cast %91 : i32 to index
    %c0_83 = arith.constant 0 : index
    %c0_84 = arith.constant 0 : index
    %93 = vector.load %arg2[%c0_82, %92, %c0_83, %c0_84] : memref<1x18x18x4xf32, #tpu.memory_space<vmem>>, vector<1x8x16x4xf32>
    %94 = vector.shape_cast %93 : vector<1x8x16x4xf32> to vector<8x16x4xf32>
    %95 = vector.shape_cast %94 : vector<8x16x4xf32> to vector<128x4xf32>
    %c2_85 = arith.constant 2 : index
    %c0_86 = arith.constant 0 : index
    %c0_87 = arith.constant 0 : index
    %c0_88 = arith.constant 0 : index
    %96 = vector.load %arg3[%c2_85, %c0_86, %c0_87, %c0_88] : memref<4x4x4x32xf32, #tpu.memory_space<vmem>>, vector<1x1x4x32xf32>
    %97 = vector.shape_cast %96 : vector<1x1x4x32xf32> to vector<4x32xf32>
    %cst_89 = arith.constant dense<0.000000e+00> : vector<128x32xf32>
    %98 = tpu.matmul %95, %97, %cst_89 {dimension_numbers = #tpu.dot_dimension_numbers<[1], [0], [0], [1], [0, 0, 1, 1], [], []>} : vector<128x4xf32>, vector<4x32xf32>, vector<128x32xf32> -> vector<128x32xf32>
    %c1_i32_90 = arith.constant 1 : i32
    %99 = arith.addi %0, %c1_i32_90 : i32
    %c0_i32_91 = arith.constant 0 : i32
    %100 = arith.addi %99, %c0_i32_91 : i32
    %c0_92 = arith.constant 0 : index
    %101 = arith.index_cast %100 : i32 to index
    %c1_93 = arith.constant 1 : index
    %c0_94 = arith.constant 0 : index
    %102 = vector.load %arg2[%c0_92, %101, %c1_93, %c0_94] : memref<1x18x18x4xf32, #tpu.memory_space<vmem>>, vector<1x8x16x4xf32>
    %103 = vector.shape_cast %102 : vector<1x8x16x4xf32> to vector<8x16x4xf32>
    %104 = vector.shape_cast %103 : vector<8x16x4xf32> to vector<128x4xf32>
    %c2_95 = arith.constant 2 : index
    %c1_96 = arith.constant 1 : index
    %c0_97 = arith.constant 0 : index
    %c0_98 = arith.constant 0 : index
    %105 = vector.load %arg3[%c2_95, %c1_96, %c0_97, %c0_98] : memref<4x4x4x32xf32, #tpu.memory_space<vmem>>, vector<1x1x4x32xf32>
    %106 = vector.shape_cast %105 : vector<1x1x4x32xf32> to vector<4x32xf32>
    %cst_99 = arith.constant dense<0.000000e+00> : vector<128x32xf32>
    %107 = tpu.matmul %104, %106, %cst_99 {dimension_numbers = #tpu.dot_dimension_numbers<[1], [0], [0], [1], [0, 0, 1, 1], [], []>} : vector<128x4xf32>, vector<4x32xf32>, vector<128x32xf32> -> vector<128x32xf32>
    %108 = arith.addf %98, %107 : vector<128x32xf32>
    %c1_i32_100 = arith.constant 1 : i32
    %109 = arith.addi %0, %c1_i32_100 : i32
    %c1_i32_101 = arith.constant 1 : i32
    %110 = arith.addi %109, %c1_i32_101 : i32
    %c0_102 = arith.constant 0 : index
    %111 = arith.index_cast %110 : i32 to index
    %c0_103 = arith.constant 0 : index
    %c0_104 = arith.constant 0 : index
    %112 = vector.load %arg2[%c0_102, %111, %c0_103, %c0_104] : memref<1x18x18x4xf32, #tpu.memory_space<vmem>>, vector<1x8x16x4xf32>
    %113 = vector.shape_cast %112 : vector<1x8x16x4xf32> to vector<8x16x4xf32>
    %114 = vector.shape_cast %113 : vector<8x16x4xf32> to vector<128x4xf32>
    %c2_105 = arith.constant 2 : index
    %c2_106 = arith.constant 2 : index
    %c0_107 = arith.constant 0 : index
    %c0_108 = arith.constant 0 : index
    %115 = vector.load %arg3[%c2_105, %c2_106, %c0_107, %c0_108] : memref<4x4x4x32xf32, #tpu.memory_space<vmem>>, vector<1x1x4x32xf32>
    %116 = vector.shape_cast %115 : vector<1x1x4x32xf32> to vector<4x32xf32>
    %cst_109 = arith.constant dense<0.000000e+00> : vector<128x32xf32>
    %117 = tpu.matmul %114, %116, %cst_109 {dimension_numbers = #tpu.dot_dimension_numbers<[1], [0], [0], [1], [0, 0, 1, 1], [], []>} : vector<128x4xf32>, vector<4x32xf32>, vector<128x32xf32> -> vector<128x32xf32>
    %118 = arith.addf %108, %117 : vector<128x32xf32>
    %c1_i32_110 = arith.constant 1 : i32
    %119 = arith.addi %0, %c1_i32_110 : i32
    %c1_i32_111 = arith.constant 1 : i32
    %120 = arith.addi %119, %c1_i32_111 : i32
    %c0_112 = arith.constant 0 : index
    %121 = arith.index_cast %120 : i32 to index
    %c1_113 = arith.constant 1 : index
    %c0_114 = arith.constant 0 : index
    %122 = vector.load %arg2[%c0_112, %121, %c1_113, %c0_114] : memref<1x18x18x4xf32, #tpu.memory_space<vmem>>, vector<1x8x16x4xf32>
    %123 = vector.shape_cast %122 : vector<1x8x16x4xf32> to vector<8x16x4xf32>
    %124 = vector.shape_cast %123 : vector<8x16x4xf32> to vector<128x4xf32>
    %c2_115 = arith.constant 2 : index
    %c3_116 = arith.constant 3 : index
    %c0_117 = arith.constant 0 : index
    %c0_118 = arith.constant 0 : index
    %125 = vector.load %arg3[%c2_115, %c3_116, %c0_117, %c0_118] : memref<4x4x4x32xf32, #tpu.memory_space<vmem>>, vector<1x1x4x32xf32>
    %126 = vector.shape_cast %125 : vector<1x1x4x32xf32> to vector<4x32xf32>
    %cst_119 = arith.constant dense<0.000000e+00> : vector<128x32xf32>
    %127 = tpu.matmul %124, %126, %cst_119 {dimension_numbers = #tpu.dot_dimension_numbers<[1], [0], [0], [1], [0, 0, 1, 1], [], []>} : vector<128x4xf32>, vector<4x32xf32>, vector<128x32xf32> -> vector<128x32xf32>
    %128 = arith.addf %118, %127 : vector<128x32xf32>
    %129 = vector.broadcast %1 : vector<1x32xf32> to vector<128x32xf32>
    %130 = arith.addf %128, %129 : vector<128x32xf32>
    %c0_120 = arith.constant 0 : index
    %c0_121 = arith.constant 0 : index
    %c64 = arith.constant 64 : index
    %131 = vector.load %arg5[%c0_120, %c0_121, %c64] : memref<1x128x128xf32, #tpu.memory_space<vmem>>, vector<1x128x32xf32>
    %132 = vector.shape_cast %131 : vector<1x128x32xf32> to vector<128x32xf32>
    %133 = vector.shape_cast %130 : vector<128x32xf32> to vector<1x128x32xf32>
    tpu.vector_store %arg5[%c0_120, %c0_121, %c64], %133 {strides = array<i32>} : memref<1x128x128xf32, #tpu.memory_space<vmem>>, vector<1x128x32xf32>,
    %c1_i32_122 = arith.constant 1 : i32
    %134 = arith.addi %0, %c1_i32_122 : i32
    %c0_i32_123 = arith.constant 0 : i32
    %135 = arith.addi %134, %c0_i32_123 : i32
    %c0_124 = arith.constant 0 : index
    %136 = arith.index_cast %135 : i32 to index
    %c1_125 = arith.constant 1 : index
    %c0_126 = arith.constant 0 : index
    %137 = vector.load %arg2[%c0_124, %136, %c1_125, %c0_126] : memref<1x18x18x4xf32, #tpu.memory_space<vmem>>, vector<1x8x16x4xf32>
    %138 = vector.shape_cast %137 : vector<1x8x16x4xf32> to vector<8x16x4xf32>
    %139 = vector.shape_cast %138 : vector<8x16x4xf32> to vector<128x4xf32>
    %c3_127 = arith.constant 3 : index
    %c0_128 = arith.constant 0 : index
    %c0_129 = arith.constant 0 : index
    %c0_130 = arith.constant 0 : index
    %140 = vector.load %arg3[%c3_127, %c0_128, %c0_129, %c0_130] : memref<4x4x4x32xf32, #tpu.memory_space<vmem>>, vector<1x1x4x32xf32>
    %141 = vector.shape_cast %140 : vector<1x1x4x32xf32> to vector<4x32xf32>
    %cst_131 = arith.constant dense<0.000000e+00> : vector<128x32xf32>
    %142 = tpu.matmul %139, %141, %cst_131 {dimension_numbers = #tpu.dot_dimension_numbers<[1], [0], [0], [1], [0, 0, 1, 1], [], []>} : vector<128x4xf32>, vector<4x32xf32>, vector<128x32xf32> -> vector<128x32xf32>
    %c1_i32_132 = arith.constant 1 : i32
    %143 = arith.addi %0, %c1_i32_132 : i32
    %c0_i32_133 = arith.constant 0 : i32
    %144 = arith.addi %143, %c0_i32_133 : i32
    %c0_134 = arith.constant 0 : index
    %145 = arith.index_cast %144 : i32 to index
    %c2_135 = arith.constant 2 : index
    %c0_136 = arith.constant 0 : index
    %146 = vector.load %arg2[%c0_134, %145, %c2_135, %c0_136] : memref<1x18x18x4xf32, #tpu.memory_space<vmem>>, vector<1x8x16x4xf32>
    %147 = vector.shape_cast %146 : vector<1x8x16x4xf32> to vector<8x16x4xf32>
    %148 = vector.shape_cast %147 : vector<8x16x4xf32> to vector<128x4xf32>
    %c3_137 = arith.constant 3 : index
    %c1_138 = arith.constant 1 : index
    %c0_139 = arith.constant 0 : index
    %c0_140 = arith.constant 0 : index
    %149 = vector.load %arg3[%c3_137, %c1_138, %c0_139, %c0_140] : memref<4x4x4x32xf32, #tpu.memory_space<vmem>>, vector<1x1x4x32xf32>
    %150 = vector.shape_cast %149 : vector<1x1x4x32xf32> to vector<4x32xf32>
    %cst_141 = arith.constant dense<0.000000e+00> : vector<128x32xf32>
    %151 = tpu.matmul %148, %150, %cst_141 {dimension_numbers = #tpu.dot_dimension_numbers<[1], [0], [0], [1], [0, 0, 1, 1], [], []>} : vector<128x4xf32>, vector<4x32xf32>, vector<128x32xf32> -> vector<128x32xf32>
    %152 = arith.addf %142, %151 : vector<128x32xf32>
    %c1_i32_142 = arith.constant 1 : i32
    %153 = arith.addi %0, %c1_i32_142 : i32
    %c1_i32_143 = arith.constant 1 : i32
    %154 = arith.addi %153, %c1_i32_143 : i32
    %c0_144 = arith.constant 0 : index
    %155 = arith.index_cast %154 : i32 to index
    %c1_145 = arith.constant 1 : index
    %c0_146 = arith.constant 0 : index
    %156 = vector.load %arg2[%c0_144, %155, %c1_145, %c0_146] : memref<1x18x18x4xf32, #tpu.memory_space<vmem>>, vector<1x8x16x4xf32>
    %157 = vector.shape_cast %156 : vector<1x8x16x4xf32> to vector<8x16x4xf32>
    %158 = vector.shape_cast %157 : vector<8x16x4xf32> to vector<128x4xf32>
    %c3_147 = arith.constant 3 : index
    %c2_148 = arith.constant 2 : index
    %c0_149 = arith.constant 0 : index
    %c0_150 = arith.constant 0 : index
    %159 = vector.load %arg3[%c3_147, %c2_148, %c0_149, %c0_150] : memref<4x4x4x32xf32, #tpu.memory_space<vmem>>, vector<1x1x4x32xf32>
    %160 = vector.shape_cast %159 : vector<1x1x4x32xf32> to vector<4x32xf32>
    %cst_151 = arith.constant dense<0.000000e+00> : vector<128x32xf32>
    %161 = tpu.matmul %158, %160, %cst_151 {dimension_numbers = #tpu.dot_dimension_numbers<[1], [0], [0], [1], [0, 0, 1, 1], [], []>} : vector<128x4xf32>, vector<4x32xf32>, vector<128x32xf32> -> vector<128x32xf32>
    %162 = arith.addf %152, %161 : vector<128x32xf32>
    %c1_i32_152 = arith.constant 1 : i32
    %163 = arith.addi %0, %c1_i32_152 : i32
    %c1_i32_153 = arith.constant 1 : i32
    %164 = arith.addi %163, %c1_i32_153 : i32
    %c0_154 = arith.constant 0 : index
    %165 = arith.index_cast %164 : i32 to index
    %c2_155 = arith.constant 2 : index
    %c0_156 = arith.constant 0 : index
    %166 = vector.load %arg2[%c0_154, %165, %c2_155, %c0_156] : memref<1x18x18x4xf32, #tpu.memory_space<vmem>>, vector<1x8x16x4xf32>
    %167 = vector.shape_cast %166 : vector<1x8x16x4xf32> to vector<8x16x4xf32>
    %168 = vector.shape_cast %167 : vector<8x16x4xf32> to vector<128x4xf32>
    %c3_157 = arith.constant 3 : index
    %c3_158 = arith.constant 3 : index
    %c0_159 = arith.constant 0 : index
    %c0_160 = arith.constant 0 : index
    %169 = vector.load %arg3[%c3_157, %c3_158, %c0_159, %c0_160] : memref<4x4x4x32xf32, #tpu.memory_space<vmem>>, vector<1x1x4x32xf32>
    %170 = vector.shape_cast %169 : vector<1x1x4x32xf32> to vector<4x32xf32>
    %cst_161 = arith.constant dense<0.000000e+00> : vector<128x32xf32>
    %171 = tpu.matmul %168, %170, %cst_161 {dimension_numbers = #tpu.dot_dimension_numbers<[1], [0], [0], [1], [0, 0, 1, 1], [], []>} : vector<128x4xf32>, vector<4x32xf32>, vector<128x32xf32> -> vector<128x32xf32>
    %172 = arith.addf %162, %171 : vector<128x32xf32>
    %173 = vector.broadcast %1 : vector<1x32xf32> to vector<128x32xf32>
    %174 = arith.addf %172, %173 : vector<128x32xf32>
    %c0_162 = arith.constant 0 : index
    %c0_163 = arith.constant 0 : index
    %c96 = arith.constant 96 : index
    %175 = vector.load %arg5[%c0_162, %c0_163, %c96] : memref<1x128x128xf32, #tpu.memory_space<vmem>>, vector<1x128x32xf32>
    %176 = vector.shape_cast %175 : vector<1x128x32xf32> to vector<128x32xf32>
    %177 = vector.shape_cast %174 : vector<128x32xf32> to vector<1x128x32xf32>
    tpu.vector_store %arg5[%c0_162, %c0_163, %c96], %177 {strides = array<i32>} : memref<1x128x128xf32, #tpu.memory_space<vmem>>, vector<1x128x32xf32>,
    return
  }
  func.func @transform_0(%arg0: i32, %arg1: i32) -> (i32, i32, i32, i32) {
    %c0_i32 = arith.constant 0 : i32
    %c0_i32_0 = arith.constant 0 : i32
    %c0_i32_1 = arith.constant 0 : i32
    %c0_i32_2 = arith.constant 0 : i32
    return %arg0, %c0_i32, %c0_i32_0, %c0_i32_1 : i32, i32, i32, i32
  }
  func.func @transform_1(%arg0: i32, %arg1: i32) -> (i32, i32, i32, i32) {
    %c0_i32 = arith.constant 0 : i32
    %c0_i32_0 = arith.constant 0 : i32
    %c0_i32_1 = arith.constant 0 : i32
    %c0_i32_2 = arith.constant 0 : i32
    %c0_i32_3 = arith.constant 0 : i32
    return %c0_i32, %c0_i32_0, %c0_i32_1, %c0_i32_2 : i32, i32, i32, i32
  }
  func.func @transform_2(%arg0: i32, %arg1: i32) -> (i32, i32) {
    %c0_i32 = arith.constant 0 : i32
    %c0_i32_0 = arith.constant 0 : i32
    %c0_i32_1 = arith.constant 0 : i32
    return %c0_i32, %c0_i32_0 : i32, i32
  }
  func.func @transform_3(%arg0: i32, %arg1: i32) -> (i32, i32, i32) {
    %c0_i32 = arith.constant 0 : i32
    %c0_i32_0 = arith.constant 0 : i32
    return %arg0, %arg1, %c0_i32 : i32, i32, i32
  }
}

</mosaic_0001>

<bundles_post_ra>
// kernel: tpu_custom_call.1
= control target key start
LH: loop header
LB: loop body
LE: loop exit
PB: predicated region body
PF: predicated region fallthrough
CT: control target
= control target key end

     0   :  { %8 = vsyncpa [#allocation3], 0  ;;  %s6898_s0 = inlined_call_operand.vmem [shape: f32[2,18,18,4], index: 0, kind: input, shape index: {}]   ;;  %s6899_s1 = inlined_call_operand.vmem [shape: f32[4,4,4,32], index: 1, kind: input, shape index: {}]   ;;  %s6900_s2 = inlined_call_operand.vmem [shape: f32[1,32], index: 2, kind: input, shape index: {}]   ;;  %s6901_s3 = inlined_call_operand.hbm [shape: f32[2,256,128], index: 3, kind: output, shape index: {}]  }
   0x1   :  { %10 = vsyncpa [#allocation3 + $0x1], 0  ;;  %s5757_s12 = smov 0   ;;  %s5759_s13 = smov 0  }
   0x2   :  { %s5761_s14 = smov 0   ;;  %s5763_s15 = smov 0  }
   0x3   :  { %s5765_s16 = smov 0   ;;  %s5767_s17 = smov 0  }
   0x4   :  { %s5769_s18 = smov 0   ;;  %s5771_s19 = smov 0  }
   0x5 LB: > { %s4179_s20 = sadd.s32 4294967295, %s5729_s19   ;;  %s4180_s21 = sadd.s32 4294967294, %s5729_s19   ;;  %s5729_s19 = sphi %s5771_s19, %s16_s19   ;;  %s5725_s18 = sphi %s5769_s18, %s6910_s18   ;;  %s5721_s17 = sphi %s5767_s17, %s6909_s17   ;;  %s5717_s16 = sphi %s5765_s16, %s6908_s16   ;;  %s5713_s15 = sphi %s5763_s15, %s6907_s15   ;;  %s5709_s14 = sphi %s5761_s14, %s6906_s14   ;;  %s5705_s13 = sphi %s5759_s13, %s6905_s13   ;;  %s5701_s12 = sphi %s5757_s12, %s6904_s12  }
   0x6   : > { %s25_s22 = sadd.s32 1, %s5721_s17  ;;  %s28_s23 = sadd.s32 1, %s5725_s18 }
   0x7   : > { %p26_p0 = scmp.ge.s32.totalorder %s25_s22, 2  ;;  %p115_p1 = scmp.ne.s32.totalorder %s5709_s14, %s5705_s13 }
   0x8   : > { %p116_p2 = scmp.eq.s32.totalorder %s4179_s20, 3  ;;  %p121_p5 = scmp.ne.s32.totalorder %s5705_s13, %s5701_s12 }
   0x9   : > { %s6912_s22 = smov (%p26_p0, %s25_s22), 0  ;;  %s6914_s23 = smov (!%p26_p0, %s28_s23), %s5725_s18 }
   0xa   : > { %s101_s24 = ssub.s32 %s5721_s17, %s6912_s22  ;;  %p5808_p3 = por %p116_p2, %p115_p1 }
   0xb   : > { %p30_p4 = scmp.ge.s32.totalorder %s6914_s23, 2  ;;  %p122_p6 = scmp.eq.s32.totalorder %s4180_s21, 3 }
   0xc   : > { %p4183_p7 = scmp.ge.s32.totalorder %s5729_s19, 1  ;;  %p154_p9 = scmp.lt.s32.totalorder %s5729_s19, 5 }
   0xd   : > { %s6916_s23 = smov (%p30_p4, %s6914_s23), 0  ;;  %p5817_p8 = por %p122_p6, %p121_p5 }
   0xe   : > { %s100_s27 = ssub.s32 %s5725_s18, %s6916_s23  ;;  %s105_s28 = sadd.s32 1, %s5709_s14 }
   0xf   : > { %s102_s29 = sor.u32 %s101_s24, %s100_s27  ;;  %p155_p10 = pnand %p4183_p7, %p154_p9 }
  0x10   : > { %p103_p11 = scmp.eq.s32.totalorder %s102_s29, 0  ;;  %v4188_v0 = vld [vmem:[%s6899_s1 + $0x4] sm:$0xf] (!%p155_p10)  ;;  %vm272_vm0 = vcmask (!%p155_p10), 1043456   ;;  %v4295_v1 = vld [vmem:[%s6899_s1 + $0x14] sm:$0xf] (!%p155_p10) }
  0x11   : > { %158 = sbr.rel (%p155_p10) target bundleno = 661 (0x295), region = 32  ;;  %p178_p12 = scmp.lt.s32.totalorder (!%p155_p10), %s5717_s16, 1  ;;  %4950 = vmatprep.subr.msk.mxu0 (!%p155_p10), %vm272_vm0, %v4188_v0  ;;  %5054 = vmatprep.subr.msk.mxu1 (!%p155_p10), %vm272_vm0, %v4295_v1  ;;  %v204_v2 = vld [vmem:[%s6899_s1] sm:$0xf] (!%p155_p10)  ;;  %v4294_v3 = vld [vmem:[%s6899_s1 + $0x10] sm:$0xf] (!%p155_p10) }
  0x12   : > { %s5826_s30 = scalar_select %p103_p11, %s5709_s14, %s105_s28  }
  0x13   : > { %4951 = vmatpush3.msk.msra.mxu0 (!%p155_p10), %vm272_vm0, %v4188_v0  ;;  %5055 = vmatpush3.msk.msra.mxu1 (!%p155_p10), %vm272_vm0, %v4295_v1  ;;  %s4187_s21 = smul.u32 (!%p155_p10), 192, %s5713_s15  ;;  %vm223_vm1 = vcmask (!%p155_p10), 31744   ;;  %v5877_v10 = vld [vmem:[%s6899_s1 + $0x8] sm:$0xf] (!%p155_p10)  ;;  %v5882_v11 = vld [vmem:[%s6899_s1 + $0x18] sm:$0xf] (!%p155_p10) }
  0x14   : > { %4976 = vmatprep.subr.msk.mxu0 (!%p155_p10), %vm272_vm0, %v204_v2  ;;  %5080 = vmatprep.subr.msk.mxu1 (!%p155_p10), %vm272_vm0, %v4294_v3  ;;  %v4275_v41 = vld [vmem:[%s6899_s1 + $0xc] sm:$0xf] (!%p155_p10)  ;;  %v4380_v42 = vld [vmem:[%s6899_s1 + $0x1c] sm:$0xf] (!%p155_p10)  ;;  %v4431_v56 = vld [vmem:[%s6899_s1 + $0x24] sm:$0xf] (!%p155_p10) }
  0x15   : > { %v4569_v57 = vld [vmem:[%s6899_s1 + $0x34] sm:$0xf] (!%p155_p10)  ;;  %v4414_v62 = vld [vmem:[%s6899_s1 + $0x20] sm:$0xf] (!%p155_p10)  ;;  %v4552_v63 = vld [vmem:[%s6899_s1 + $0x30] sm:$0xf] (!%p155_p10) }
  0x16   : > { %s175_s28 = sand.u32 (!%p155_p10), 1, %s5705_s13   ;;  %vm1102_vm2 = vcmask (!%p155_p10), 261120   ;;  %s5731_s7 = smov (!%p155_p10), 32   ;;  %vm2087_vm3 = vcmask (!%p155_p10), 523520   ;;  %vm3075_vm4 = vcmask (!%p155_p10), 785920   ;;  %vm4060_vm5 = vcmask (!%p155_p10), 1048320  }
  0x17   : > { %s5732_s8 = smov (!%p155_p10), 64   ;;  %s5733_s9 = smov (!%p155_p10), 96  }
  0x18   : > { %s179_s20 = scalar_select %p178_p12, %s5717_s16, 1 }
  0x19   : > { %s4673_s10 = sshll.u32 %s5713_s15, 4  ;;  %s4674_s11 = sshll.u32 %s5717_s16, 5 }
  0x1a   : > { %s5558_s24 = smul.u32 432, %s179_s20  ;;  %s4090_s20 = sadd.s32 %s4674_s11, %s4673_s10 }
  0x1b   : > { %s5734_s6 = smov [#allocation2]  }
  0x1c   : > { %s182_s29 = scalar_lea.vmem %s6898_s0, %s5558_s24 }
  0x1d   : > { %s5852_s4 = scalar_lea.vmem %s182_s29, %s4187_s21  ;;  %s4184_s29 = sshll.u32 %s175_s28, 7 }
  0x1e   : > { %v5855_v4 = vld [vmem:[%s5852_s4 + $0x1] sm:$0xff]  ;;  %v5859_v6 = vld [vmem:[%s5852_s4 + $0x9] sm:$0xff]  ;;  %v5866_v8 = vld [vmem:[%s5852_s4 + $0x19] sm:$0xff]  ;;  %s4675_s21 = sshll.u32 %s4090_s20, 7 }
  0x1f   : > { %v1137_v5 = vld [vmem:[%s5852_s4 + $0x2] sm:$0xff]  ;;  %4952 = vmatprep.mubr.msk.f32.mxu0 %vm223_vm1, %v5855_v4  ;;  %v1138_v7 = vld [vmem:[%s5852_s4 + $0xa] sm:$0xff]  ;;  %v5869_v9 = vld [vmem:[%s5852_s4 + $0x1a] sm:$0xff]  ;;  %s6836_s27 = scalar_lea.hbm %s6901_s3, %s4675_s21 }
  0x20   : > { %5056 = vmatprep.mubr.msk.f32.mxu1 %vm223_vm1, %v1137_v5  ;;  %4953 = vmatmul.mubr.msk.f32.vlgmr.msra.gmra.mrb[0].mxu0 %vm223_vm1, %v5859_v6  ;;  %v5888_v12 = vld [vmem:[%s5852_s4 + $0x21] sm:$0xff]  ;;  %v5897_v14 = vld [vmem:[%s5852_s4 + $0x31] sm:$0xff]  ;;  %v5915_v16 = vld [vmem:[%s5852_s4 + $0x39] sm:$0xff] }
  0x21   : > { %5057 = vmatmul.mubr.msk.f32.vlgmr.msra.gmra.mrb[0].mxu1 %vm223_vm1, %v1138_v7  ;;  %4977 = vmatpush3.msk.msra.mxu0 %vm272_vm0, %v204_v2  ;;  %v5891_v13 = vld [vmem:[%s5852_s4 + $0x22] sm:$0xff]  ;;  %v5900_v15 = vld [vmem:[%s5852_s4 + $0x32] sm:$0xff]  ;;  %v5918_v17 = vld [vmem:[%s5852_s4 + $0x3a] sm:$0xff] }
  0x22   : > { %4955 = vmatprep.mubr.msk.f32.mxu0 %vm223_vm1, %v5866_v8  ;;  %5059 = vmatprep.mubr.msk.f32.mxu1 %vm223_vm1, %v5869_v9  ;;  %v5921_v18 = vld [vmem:[%s5852_s4 + $0x49] sm:$0xff]  ;;  %v5935_v20 = vld [vmem:[%s5852_s4 + $0x51] sm:$0xff]  ;;  %v5941_v22 = vld [vmem:[%s5852_s4 + $0x61] sm:$0xff] }
  0x23   : > { %5081 = vmatpush3.msk.msra.mxu1 %vm272_vm0, %v4294_v3  ;;  %5002 = vmatprep.subr.msk.mxu0 %vm272_vm0, %v5877_v10  ;;  %v5924_v19 = vld [vmem:[%s5852_s4 + $0x4a] sm:$0xff]  ;;  %v5938_v21 = vld [vmem:[%s5852_s4 + $0x52] sm:$0xff]  ;;  %v5944_v23 = vld [vmem:[%s5852_s4 + $0x62] sm:$0xff] }
  0x24   : > { %5106 = vmatprep.subr.msk.mxu1 %vm272_vm0, %v5882_v11  ;;  %4956 = vmatmul.mubr.msk.f32.gmra.mrb[2].mxu0 %vm223_vm1, %v5888_v12  ;;  %v5955_v24 = vld [vmem:[%s5852_s4 + $0x69] sm:$0xff]  ;;  %v5961_v26 = vld [vmem:[%s5852_s4 + $0x79] sm:$0xff]  ;;  %v5975_v28 = vld [vmem:[%s5852_s4 + $0x81] sm:$0xff] }
  0x25   : > { %5060 = vmatmul.mubr.msk.f32.gmra.mrb[2].mxu1 %vm223_vm1, %v5891_v13  ;;  %4958 = vmatprep.mubr.msk.f32.mxu0 %vm223_vm1, %v5897_v14  ;;  %v5958_v25 = vld [vmem:[%s5852_s4 + $0x6a] sm:$0xff]  ;;  %v5964_v27 = vld [vmem:[%s5852_s4 + $0x7a] sm:$0xff]  ;;  %v5978_v29 = vld [vmem:[%s5852_s4 + $0x82] sm:$0xff] }
  0x26   : > { %5062 = vmatprep.mubr.msk.f32.mxu1 %vm223_vm1, %v5900_v15  ;;  %v5981_v30 = vld [vmem:[%s5852_s4 + $0x91] sm:$0xff]  ;;  %v5995_v32 = vld [vmem:[%s5852_s4 + $0x99] sm:$0xff]  ;;  %v6001_v34 = vld [vmem:[%s5852_s4 + $0xa9] sm:$0xff] }
  0x27   : > { %v5984_v31 = vld [vmem:[%s5852_s4 + $0x92] sm:$0xff]  ;;  %v5998_v33 = vld [vmem:[%s5852_s4 + $0x9a] sm:$0xff]  ;;  %v6004_v35 = vld [vmem:[%s5852_s4 + $0xaa] sm:$0xff] }
  0x28   : > { %4959 = vmatmul.mubr.msk.f32.gmra.mrb[4].mxu0 %vm223_vm1, %v5915_v16  ;;  %v6015_v36 = vld [vmem:[%s5852_s4 + $0xb1] sm:$0xff]  ;;  %v188_v38 = vld [vmem:[%s5852_s4] sm:$0xff]  ;;  %v189_v39 = vld [vmem:[%s5852_s4 + $0x8] sm:$0xff] }
  0x29   : > { %5063 = vmatmul.mubr.msk.f32.gmra.mrb[4].mxu1 %vm223_vm1, %v5918_v17  ;;  %4961 = vmatprep.mubr.msk.f32.mxu0 %vm223_vm1, %v5921_v18  ;;  %v6018_v37 = vld [vmem:[%s5852_s4 + $0xb2] sm:$0xff]  ;;  %v6046_v43 = vld [vmem:[%s5852_s4 + $0x20] sm:$0xff]  ;;  %v6069_v46 = vld [vmem:[%s5852_s4 + $0x48] sm:$0xff] }
  0x2a   : > { %5065 = vmatprep.mubr.msk.f32.mxu1 %vm223_vm1, %v5924_v19  ;;  %v6030_v40 = vld [vmem:[%s5852_s4 + $0x18] sm:$0xff]  ;;  %v6053_v44 = vld [vmem:[%s5852_s4 + $0x30] sm:$0xff]  ;;  %v6083_v48 = vld [vmem:[%s5852_s4 + $0x60] sm:$0xff] }
  0x2b   : > { %v6066_v45 = vld [vmem:[%s5852_s4 + $0x38] sm:$0xff]  ;;  %v6080_v47 = vld [vmem:[%s5852_s4 + $0x50] sm:$0xff]  ;;  %v6094_v49 = vld [vmem:[%s5852_s4 + $0x68] sm:$0xff] }
  0x2c   : > { %4962 = vmatmul.mubr.msk.f32.gmra.mrb[6].mxu0 %vm223_vm1, %v5935_v20  ;;  %v6097_v50 = vld [vmem:[%s5852_s4 + $0x78] sm:$0xff]  ;;  %v6108_v51 = vld [vmem:[%s5852_s4 + $0x80] sm:$0xff]  ;;  %v6111_v52 = vld [vmem:[%s5852_s4 + $0x90] sm:$0xff] }
  0x2d   : > { %5066 = vmatmul.mubr.msk.f32.gmra.mrb[6].mxu1 %vm223_vm1, %v5938_v21  ;;  %4964 = vmatprep.mubr.msk.f32.mxu0 %vm223_vm1, %v5941_v22  ;;  %v6122_v53 = vld [vmem:[%s5852_s4 + $0x98] sm:$0xff]  ;;  %v6125_v54 = vld [vmem:[%s5852_s4 + $0xa8] sm:$0xff]  ;;  %v6136_v55 = vld [vmem:[%s5852_s4 + $0xb0] sm:$0xff] }
  0x2e   : > { %5068 = vmatprep.mubr.msk.f32.mxu1 %vm223_vm1, %v5944_v23  ;;  %v6205_v58 = vld [vmem:[%s5852_s4 + $0xc0] sm:$0xff]  ;;  %v6219_v60 = vld [vmem:[%s5852_s4 + $0xc8] sm:$0xff]  ;;  %v4620_v3 = vld [vmem:[%s6899_s1 + $0x38] sm:$0xf] }
  0x2f   : > { %v6208_v59 = vld [vmem:[%s5852_s4 + $0xc1] sm:$0xff]  ;;  %v6222_v61 = vld [vmem:[%s5852_s4 + $0xc9] sm:$0xff]  ;;  %v4654_v5 = vld [vmem:[%s6899_s1 + $0x3c] sm:$0xf] }
  0x30   : > { %4965 = vmatmul.mubr.msk.f32.gmra.mrb[8].mxu0 %vm223_vm1, %v5955_v24  ;;  %v6291_v0 = vld [vmem:[%s5852_s4 + $0xc2] sm:$0xff]  ;;  %v6302_v1 = vld [vmem:[%s5852_s4 + $0xca] sm:$0xff]  ;;  %v4618_v7 = vld [vmem:[%s5852_s4 + $0xd9] sm:$0xff] }
  0x31   : > { %5069 = vmatmul.mubr.msk.f32.gmra.mrb[8].mxu1 %vm223_vm1, %v5958_v25  ;;  %4967 = vmatprep.mubr.msk.f32.mxu0 %vm223_vm1, %v5961_v26  ;;  %v4484_v2 = vld [vmem:[%s6899_s1 + $0x28] sm:$0xf] }
  0x32   : > { %5071 = vmatprep.mubr.msk.f32.mxu1 %vm223_vm1, %v5964_v27 }
  0x34   : > { %4968 = vmatmul.mubr.msk.f32.gmra.mrb[10].mxu0 %vm223_vm1, %v5975_v28 }
  0x35   : > { %5072 = vmatmul.mubr.msk.f32.gmra.mrb[10].mxu1 %vm223_vm1, %v5978_v29  ;;  %4970 = vmatprep.mubr.msk.f32.mxu0 %vm223_vm1, %v5981_v30 }
  0x36   : > { %5074 = vmatprep.mubr.msk.f32.mxu1 %vm223_vm1, %v5984_v31 }
  0x38   : > { %4971 = vmatmul.mubr.msk.f32.gmra.mrb[12].mxu0 %vm223_vm1, %v5995_v32 }
  0x39   : > { %5075 = vmatmul.mubr.msk.f32.gmra.mrb[12].mxu1 %vm223_vm1, %v5998_v33  ;;  %4973 = vmatprep.mubr.msk.f32.mxu0 %vm223_vm1, %v6001_v34 }
  0x3a   : > { %5077 = vmatprep.mubr.msk.f32.mxu1 %vm223_vm1, %v6004_v35 }
  0x3c   : > { %4974 = vmatmul.mubr.msk.f32.gmra.mrb[14].mxu0 %vm223_vm1, %v6015_v36 }
  0x3d   : > { %5078 = vmatmul.mubr.msk.f32.gmra.mrb[14].mxu1 %vm223_vm1, %v6018_v37  ;;  %4978 = vmatprep.mubr.msk.f32.mxu0 %vm223_vm1, %v188_v38 }
  0x3e   : > { %5082 = vmatprep.mubr.msk.f32.mxu1 %vm223_vm1, %v5855_v4  ;;  %v4518_v4 = vld [vmem:[%s6899_s1 + $0x2c] sm:$0xf] }
  0x40   : > { %4979 = vmatmul.mubr.msk.f32.vlgmr.msra.gmra.mrb[0].mxu0 %vm223_vm1, %v189_v39 }
  0x41   : > { %5083 = vmatmul.mubr.msk.f32.vlgmr.msra.gmra.mrb[0].mxu1 %vm223_vm1, %v5859_v6  ;;  %5003 = vmatpush3.msk.msra.mxu0 %vm272_vm0, %v5877_v10  ;;  %v4482_v6 = vld [vmem:[%s5852_s4 + $0xd8] sm:$0xff] }
  0x42   : > { %4981 = vmatprep.mubr.msk.f32.mxu0 %vm223_vm1, %v6030_v40  ;;  %5085 = vmatprep.mubr.msk.f32.mxu1 %vm223_vm1, %v5866_v8  ;;  %v4652_v10 = vld [vmem:[%s5852_s4 + $0xda] sm:$0xff] }
  0x43   : > { %5107 = vmatpush3.msk.msra.mxu1 %vm272_vm0, %v5882_v11  ;;  %5028 = vmatprep.subr.msk.mxu0 %vm272_vm0, %v4275_v41  ;;  %v4653_v11 = vld [vmem:[%s5852_s4 + $0xe2] sm:$0xff] }
  0x44   : > { %5132 = vmatprep.subr.msk.mxu1 %vm272_vm0, %v4380_v42  ;;  %4982 = vmatmul.mubr.msk.f32.gmra.mrb[2].mxu0 %vm223_vm1, %v6046_v43 }
  0x45   : > { %5086 = vmatmul.mubr.msk.f32.gmra.mrb[2].mxu1 %vm223_vm1, %v5888_v12  ;;  %4984 = vmatprep.mubr.msk.f32.mxu0 %vm223_vm1, %v6053_v44 }
  0x46   : > { %5088 = vmatprep.mubr.msk.f32.mxu1 %vm223_vm1, %v5897_v14 }
  0x48   : > { %4985 = vmatmul.mubr.msk.f32.gmra.mrb[4].mxu0 %vm223_vm1, %v6066_v45 }
  0x49   : > { %5089 = vmatmul.mubr.msk.f32.gmra.mrb[4].mxu1 %vm223_vm1, %v5915_v16  ;;  %4987 = vmatprep.mubr.msk.f32.mxu0 %vm223_vm1, %v6069_v46 }
  0x4a   : > { %5091 = vmatprep.mubr.msk.f32.mxu1 %vm223_vm1, %v5921_v18 }
  0x4c   : > { %4988 = vmatmul.mubr.msk.f32.gmra.mrb[6].mxu0 %vm223_vm1, %v6080_v47 }
  0x4d   : > { %5092 = vmatmul.mubr.msk.f32.gmra.mrb[6].mxu1 %vm223_vm1, %v5935_v20  ;;  %4990 = vmatprep.mubr.msk.f32.mxu0 %vm223_vm1, %v6083_v48 }
  0x4e   : > { %5094 = vmatprep.mubr.msk.f32.mxu1 %vm223_vm1, %v5941_v22 }
  0x50   : > { %4991 = vmatmul.mubr.msk.f32.gmra.mrb[8].mxu0 %vm223_vm1, %v6094_v49 }
  0x51   : > { %5095 = vmatmul.mubr.msk.f32.gmra.mrb[8].mxu1 %vm223_vm1, %v5955_v24  ;;  %4993 = vmatprep.mubr.msk.f32.mxu0 %vm223_vm1, %v6097_v50 }
  0x52   : > { %5097 = vmatprep.mubr.msk.f32.mxu1 %vm223_vm1, %v5961_v26 }
  0x54   : > { %4994 = vmatmul.mubr.msk.f32.gmra.mrb[10].mxu0 %vm223_vm1, %v6108_v51 }
  0x55   : > { %5098 = vmatmul.mubr.msk.f32.gmra.mrb[10].mxu1 %vm223_vm1, %v5975_v28  ;;  %4996 = vmatprep.mubr.msk.f32.mxu0 %vm223_vm1, %v6111_v52 }
  0x56   : > { %5100 = vmatprep.mubr.msk.f32.mxu1 %vm223_vm1, %v5981_v30 }
  0x58   : > { %4997 = vmatmul.mubr.msk.f32.gmra.mrb[12].mxu0 %vm223_vm1, %v6122_v53 }
  0x59   : > { %5101 = vmatmul.mubr.msk.f32.gmra.mrb[12].mxu1 %vm223_vm1, %v5995_v32  ;;  %4999 = vmatprep.mubr.msk.f32.mxu0 %vm223_vm1, %v6125_v54 }
  0x5a   : > { %5103 = vmatprep.mubr.msk.f32.mxu1 %vm223_vm1, %v6001_v34 }
  0x5c   : > { %5000 = vmatmul.mubr.msk.f32.gmra.mrb[14].mxu0 %vm223_vm1, %v6136_v55 }
  0x5d   : > { %5104 = vmatmul.mubr.msk.f32.gmra.mrb[14].mxu1 %vm223_vm1, %v6015_v36  ;;  %5004 = vmatprep.mubr.msk.f32.mxu0 %vm223_vm1, %v6030_v40 }
  0x5e   : > { %5108 = vmatprep.mubr.msk.f32.mxu1 %vm223_vm1, %v5866_v8 }
  0x60   : > { %5005 = vmatmul.mubr.msk.f32.vlgmr.msra.gmra.mrb[0].mxu0 %vm223_vm1, %v6046_v43 }
  0x61   : > { %5109 = vmatmul.mubr.msk.f32.vlgmr.msra.gmra.mrb[0].mxu1 %vm223_vm1, %v5888_v12  ;;  %5029 = vmatpush3.msk.msra.mxu0 %vm272_vm0, %v4275_v41 }
  0x62   : > { %5007 = vmatprep.mubr.msk.f32.mxu0 %vm223_vm1, %v6053_v44  ;;  %5111 = vmatprep.mubr.msk.f32.mxu1 %vm223_vm1, %v5897_v14 }
  0x63   : > { %5133 = vmatpush3.msk.msra.mxu1 %vm272_vm0, %v4380_v42  ;;  %5158 = vmatprep.subr.msk.mxu0 %vm272_vm0, %v4431_v56 }
  0x64   : > { %5262 = vmatprep.subr.msk.mxu1 %vm272_vm0, %v4569_v57  ;;  %5008 = vmatmul.mubr.msk.f32.gmra.mrb[2].mxu0 %vm223_vm1, %v6066_v45 }
  0x65   : > { %5112 = vmatmul.mubr.msk.f32.gmra.mrb[2].mxu1 %vm223_vm1, %v5915_v16  ;;  %5010 = vmatprep.mubr.msk.f32.mxu0 %vm223_vm1, %v6069_v46 }
  0x66   : > { %5114 = vmatprep.mubr.msk.f32.mxu1 %vm223_vm1, %v5921_v18 }
  0x68   : > { %5011 = vmatmul.mubr.msk.f32.gmra.mrb[4].mxu0 %vm223_vm1, %v6080_v47 }
  0x69   : > { %5115 = vmatmul.mubr.msk.f32.gmra.mrb[4].mxu1 %vm223_vm1, %v5935_v20  ;;  %5013 = vmatprep.mubr.msk.f32.mxu0 %vm223_vm1, %v6083_v48 }
  0x6a   : > { %5117 = vmatprep.mubr.msk.f32.mxu1 %vm223_vm1, %v5941_v22 }
  0x6c   : > { %5014 = vmatmul.mubr.msk.f32.gmra.mrb[6].mxu0 %vm223_vm1, %v6094_v49 }
  0x6d   : > { %5118 = vmatmul.mubr.msk.f32.gmra.mrb[6].mxu1 %vm223_vm1, %v5955_v24  ;;  %5016 = vmatprep.mubr.msk.f32.mxu0 %vm223_vm1, %v6097_v50 }
  0x6e   : > { %5120 = vmatprep.mubr.msk.f32.mxu1 %vm223_vm1, %v5961_v26 }
  0x70   : > { %5017 = vmatmul.mubr.msk.f32.gmra.mrb[8].mxu0 %vm223_vm1, %v6108_v51 }
  0x71   : > { %5121 = vmatmul.mubr.msk.f32.gmra.mrb[8].mxu1 %vm223_vm1, %v5975_v28  ;;  %5019 = vmatprep.mubr.msk.f32.mxu0 %vm223_vm1, %v6111_v52 }
  0x72   : > { %5123 = vmatprep.mubr.msk.f32.mxu1 %vm223_vm1, %v5981_v30 }
  0x74   : > { %5020 = vmatmul.mubr.msk.f32.gmra.mrb[10].mxu0 %vm223_vm1, %v6122_v53 }
  0x75   : > { %5124 = vmatmul.mubr.msk.f32.gmra.mrb[10].mxu1 %vm223_vm1, %v5995_v32  ;;  %5022 = vmatprep.mubr.msk.f32.mxu0 %vm223_vm1, %v6125_v54 }
  0x76   : > { %5126 = vmatprep.mubr.msk.f32.mxu1 %vm223_vm1, %v6001_v34 }
  0x78   : > { %5023 = vmatmul.mubr.msk.f32.gmra.mrb[12].mxu0 %vm223_vm1, %v6136_v55 }
  0x79   : > { %5127 = vmatmul.mubr.msk.f32.gmra.mrb[12].mxu1 %vm223_vm1, %v6015_v36  ;;  %5025 = vmatprep.mubr.msk.f32.mxu0 %vm223_vm1, %v6205_v58 }
  0x7a   : > { %5129 = vmatprep.mubr.msk.f32.mxu1 %vm223_vm1, %v6208_v59 }
  0x7c   : > { %5026 = vmatmul.mubr.msk.f32.gmra.mrb[14].mxu0 %vm223_vm1, %v6219_v60 }
  0x7d   : > { %5130 = vmatmul.mubr.msk.f32.gmra.mrb[14].mxu1 %vm223_vm1, %v6222_v61  ;;  %5030 = vmatprep.mubr.msk.f32.mxu0 %vm223_vm1, %v5866_v8 }
  0x7e   : > { %5134 = vmatprep.mubr.msk.f32.mxu1 %vm223_vm1, %v5869_v9 }
  0x80   : > { %5031 = vmatmul.mubr.msk.f32.vlgmr.msra.gmra.mrb[0].mxu0 %vm223_vm1, %v5888_v12 }
  0x81   : > { %5135 = vmatmul.mubr.msk.f32.vlgmr.msra.gmra.mrb[0].mxu1 %vm223_vm1, %v5891_v13  ;;  %5159 = vmatpush3.msk.msra.mxu0 %vm272_vm0, %v4431_v56 }
  0x82   : > { %5033 = vmatprep.mubr.msk.f32.mxu0 %vm223_vm1, %v5897_v14  ;;  %5137 = vmatprep.mubr.msk.f32.mxu1 %vm223_vm1, %v5900_v15 }
  0x83   : > { %5263 = vmatpush3.msk.msra.mxu1 %vm272_vm0, %v4569_v57  ;;  %5184 = vmatprep.subr.msk.mxu0 %vm272_vm0, %v4414_v62 }
  0x84   : > { %5288 = vmatprep.subr.msk.mxu1 %vm272_vm0, %v4552_v63  ;;  %5034 = vmatmul.mubr.msk.f32.gmra.mrb[2].mxu0 %vm223_vm1, %v5915_v16 }
  0x85   : > { %5138 = vmatmul.mubr.msk.f32.gmra.mrb[2].mxu1 %vm223_vm1, %v5918_v17  ;;  %5036 = vmatprep.mubr.msk.f32.mxu0 %vm223_vm1, %v5921_v18 }
  0x86   : > { %5140 = vmatprep.mubr.msk.f32.mxu1 %vm223_vm1, %v5924_v19 }
  0x88   : > { %5037 = vmatmul.mubr.msk.f32.gmra.mrb[4].mxu0 %vm223_vm1, %v5935_v20 }
  0x89   : > { %5141 = vmatmul.mubr.msk.f32.gmra.mrb[4].mxu1 %vm223_vm1, %v5938_v21  ;;  %5039 = vmatprep.mubr.msk.f32.mxu0 %vm223_vm1, %v5941_v22 }
  0x8a   : > { %5143 = vmatprep.mubr.msk.f32.mxu1 %vm223_vm1, %v5944_v23 }
  0x8c   : > { %5040 = vmatmul.mubr.msk.f32.gmra.mrb[6].mxu0 %vm223_vm1, %v5955_v24 }
  0x8d   : > { %5144 = vmatmul.mubr.msk.f32.gmra.mrb[6].mxu1 %vm223_vm1, %v5958_v25  ;;  %5042 = vmatprep.mubr.msk.f32.mxu0 %vm223_vm1, %v5961_v26 }
  0x8e   : > { %5146 = vmatprep.mubr.msk.f32.mxu1 %vm223_vm1, %v5964_v27 }
  0x90   : > { %5043 = vmatmul.mubr.msk.f32.gmra.mrb[8].mxu0 %vm223_vm1, %v5975_v28 }
  0x91   : > { %5147 = vmatmul.mubr.msk.f32.gmra.mrb[8].mxu1 %vm223_vm1, %v5978_v29  ;;  %5045 = vmatprep.mubr.msk.f32.mxu0 %vm223_vm1, %v5981_v30 }
  0x92   : > { %5149 = vmatprep.mubr.msk.f32.mxu1 %vm223_vm1, %v5984_v31 }
  0x94   : > { %5046 = vmatmul.mubr.msk.f32.gmra.mrb[10].mxu0 %vm223_vm1, %v5995_v32 }
  0x95   : > { %5150 = vmatmul.mubr.msk.f32.gmra.mrb[10].mxu1 %vm223_vm1, %v5998_v33  ;;  %5048 = vmatprep.mubr.msk.f32.mxu0 %vm223_vm1, %v6001_v34 }
  0x96   : > { %5152 = vmatprep.mubr.msk.f32.mxu1 %vm223_vm1, %v6004_v35 }
  0x98   : > { %5049 = vmatmul.mubr.msk.f32.gmra.mrb[12].mxu0 %vm223_vm1, %v6015_v36 }
  0x99   : > { %5153 = vmatmul.mubr.msk.f32.gmra.mrb[12].mxu1 %vm223_vm1, %v6018_v37  ;;  %5051 = vmatprep.mubr.msk.f32.mxu0 %vm223_vm1, %v6208_v59 }
  0x9a   : > { %5155 = vmatprep.mubr.msk.f32.mxu1 %vm223_vm1, %v6291_v0 }
  0x9c   : > { %5052 = vmatmul.mubr.msk.f32.gmra.mrb[14].mxu0 %vm223_vm1, %v6222_v61 }
  0x9d   : > { %5156 = vmatmul.mubr.msk.f32.gmra.mrb[14].mxu1 %vm223_vm1, %v6302_v1  ;;  %5160 = vmatprep.mubr.msk.f32.mxu0 %vm223_vm1, %v5866_v8 }
  0x9e   : > { %5264 = vmatprep.mubr.msk.f32.mxu1 %vm223_vm1, %v5869_v9  ;;  %v4619_v9 = vld [vmem:[%s5852_s4 + $0xe1] sm:$0xff] }
  0xa0   : > { %5161 = vmatmul.mubr.msk.f32.vlgmr.msra.gmra.mrb[16].mxu0 %vm223_vm1, %v5888_v12 }
  0xa1   : > { %5265 = vmatmul.mubr.msk.f32.vlgmr.msra.gmra.mrb[16].mxu1 %vm223_vm1, %v5891_v13  ;;  %5185 = vmatpush3.msk.msra.mxu0 %vm272_vm0, %v4414_v62 }
  0xa2   : > { %5163 = vmatprep.mubr.msk.f32.mxu0 %vm223_vm1, %v5897_v14  ;;  %5267 = vmatprep.mubr.msk.f32.mxu1 %vm223_vm1, %v5900_v15 }
  0xa3   : > { %5289 = vmatpush3.msk.msra.mxu1 %vm272_vm0, %v4552_v63  ;;  %5210 = vmatprep.subr.msk.mxu0 %vm272_vm0, %v4484_v2 }
  0xa4   : > { %5314 = vmatprep.subr.msk.mxu1 %vm272_vm0, %v4620_v3  ;;  %5164 = vmatmul.mubr.msk.f32.gmra.mrb[18].mxu0 %vm223_vm1, %v5915_v16 }
  0xa5   : > { %5268 = vmatmul.mubr.msk.f32.gmra.mrb[18].mxu1 %vm223_vm1, %v5918_v17  ;;  %5166 = vmatprep.mubr.msk.f32.mxu0 %vm223_vm1, %v5921_v18 }
  0xa6   : > { %5270 = vmatprep.mubr.msk.f32.mxu1 %vm223_vm1, %v5924_v19 }
  0xa8   : > { %5167 = vmatmul.mubr.msk.f32.gmra.mrb[20].mxu0 %vm223_vm1, %v5935_v20 }
  0xa9   : > { %5271 = vmatmul.mubr.msk.f32.gmra.mrb[20].mxu1 %vm223_vm1, %v5938_v21  ;;  %5169 = vmatprep.mubr.msk.f32.mxu0 %vm223_vm1, %v5941_v22 }
  0xaa   : > { %5273 = vmatprep.mubr.msk.f32.mxu1 %vm223_vm1, %v5944_v23 }
  0xac   : > { %5170 = vmatmul.mubr.msk.f32.gmra.mrb[22].mxu0 %vm223_vm1, %v5955_v24 }
  0xad   : > { %5274 = vmatmul.mubr.msk.f32.gmra.mrb[22].mxu1 %vm223_vm1, %v5958_v25  ;;  %5172 = vmatprep.mubr.msk.f32.mxu0 %vm223_vm1, %v5961_v26 }
  0xae   : > { %5276 = vmatprep.mubr.msk.f32.mxu1 %vm223_vm1, %v5964_v27 }
  0xb0   : > { %5173 = vmatmul.mubr.msk.f32.gmra.mrb[24].mxu0 %vm223_vm1, %v5975_v28 }
  0xb1   : > { %5277 = vmatmul.mubr.msk.f32.gmra.mrb[24].mxu1 %vm223_vm1, %v5978_v29  ;;  %5175 = vmatprep.mubr.msk.f32.mxu0 %vm223_vm1, %v5981_v30 }
  0xb2   : > { %5279 = vmatprep.mubr.msk.f32.mxu1 %vm223_vm1, %v5984_v31 }
  0xb4   : > { %5176 = vmatmul.mubr.msk.f32.gmra.mrb[26].mxu0 %vm223_vm1, %v5995_v32 }
  0xb5   : > { %5280 = vmatmul.mubr.msk.f32.gmra.mrb[26].mxu1 %vm223_vm1, %v5998_v33  ;;  %5178 = vmatprep.mubr.msk.f32.mxu0 %vm223_vm1, %v6001_v34 }
  0xb6   : > { %5282 = vmatprep.mubr.msk.f32.mxu1 %vm223_vm1, %v6004_v35 }
  0xb8   : > { %5179 = vmatmul.mubr.msk.f32.gmra.mrb[28].mxu0 %vm223_vm1, %v6015_v36 }
  0xb9   : > { %5283 = vmatmul.mubr.msk.f32.gmra.mrb[28].mxu1 %vm223_vm1, %v6018_v37  ;;  %5181 = vmatprep.mubr.msk.f32.mxu0 %vm223_vm1, %v6208_v59 }
  0xba   : > { %5285 = vmatprep.mubr.msk.f32.mxu1 %vm223_vm1, %v6291_v0 }
  0xbc   : > { %5182 = vmatmul.mubr.msk.f32.gmra.mrb[30].mxu0 %vm223_vm1, %v6222_v61 }
  0xbd   : > { %5286 = vmatmul.mubr.msk.f32.gmra.mrb[30].mxu1 %vm223_vm1, %v6302_v1  ;;  %5186 = vmatprep.mubr.msk.f32.mxu0 %vm223_vm1, %v6030_v40 }
  0xbe   : > { %5290 = vmatprep.mubr.msk.f32.mxu1 %vm223_vm1, %v5866_v8  ;;  %v4483_v8 = vld [vmem:[%s5852_s4 + $0xe0] sm:$0xff]  ;;  %s6595_s4 = scalar_lea.vmem [#allocation2], %s4184_s29  ;;  %s6846_s29 = scalar_lea.sflag [#allocation3], %s175_s28 }
  0xbf   : > { %s4093_s24 = sshll.u32 %s6595_s4, 4  ;;  %s6838_s24 = int_to_ptr.vmem [resolvable:$true] %s4093_s24 }
  0xc0   : > { %5187 = vmatmul.mubr.msk.f32.vlgmr.msra.gmra.mrb[16].mxu0 %vm223_vm1, %v6046_v43  ;;  %s5635_s5 = scalar_lea.vmem %s6838_s24, 2048 }
  0xc1   : > { %5291 = vmatmul.mubr.msk.f32.vlgmr.msra.gmra.mrb[16].mxu1 %vm223_vm1, %v5888_v12  ;;  %5211 = vmatpush3.msk.msra.mxu0 %vm272_vm0, %v4484_v2  ;;  %v6590_v12 = vld [vmem:[%s6900_s2] ss:$0 sm:$0xff]  ;;  %p5636_p13 = scmp.ne.s32.totalorder %s6838_s24, %s5635_s5 }
  0xc2   : > { %5189 = vmatprep.mubr.msk.f32.mxu0 %vm223_vm1, %v6053_v44  ;;  %5293 = vmatprep.mubr.msk.f32.mxu1 %vm223_vm1, %v5897_v14 }
  0xc3   : > { %5315 = vmatpush3.msk.msra.mxu1 %vm272_vm0, %v4620_v3  ;;  %5236 = vmatprep.subr.msk.mxu0 %vm272_vm0, %v4518_v4  ;;  %p5637_p0 = pnand %p5636_p13, %p5808_p3 }
  0xc4   : > { %5340 = vmatprep.subr.msk.mxu1 %vm272_vm0, %v4654_v5  ;;  %5190 = vmatmul.mubr.msk.f32.gmra.mrb[18].mxu0 %vm223_vm1, %v6066_v45 }
  0xc5   : > { %5294 = vmatmul.mubr.msk.f32.gmra.mrb[18].mxu1 %vm223_vm1, %v5915_v16  ;;  %5192 = vmatprep.mubr.msk.f32.mxu0 %vm223_vm1, %v6069_v46  ;;  %p5638_p1 = pneg %p5637_p0 }
  0xc6   : > { %5296 = vmatprep.mubr.msk.f32.mxu1 %vm223_vm1, %v5921_v18 }
  0xc8   : > { %5193 = vmatmul.mubr.msk.f32.gmra.mrb[20].mxu0 %vm223_vm1, %v6080_v47 }
  0xc9   : > { %5297 = vmatmul.mubr.msk.f32.gmra.mrb[20].mxu1 %vm223_vm1, %v5935_v20  ;;  %5195 = vmatprep.mubr.msk.f32.mxu0 %vm223_vm1, %v6083_v48 }
  0xca   : > { %5299 = vmatprep.mubr.msk.f32.mxu1 %vm223_vm1, %v5941_v22 }
  0xcc   : > { %5196 = vmatmul.mubr.msk.f32.gmra.mrb[22].mxu0 %vm223_vm1, %v6094_v49 }
  0xcd   : > { %5300 = vmatmul.mubr.msk.f32.gmra.mrb[22].mxu1 %vm223_vm1, %v5955_v24  ;;  %5198 = vmatprep.mubr.msk.f32.mxu0 %vm223_vm1, %v6097_v50 }
  0xce   : > { %5302 = vmatprep.mubr.msk.f32.mxu1 %vm223_vm1, %v5961_v26 }
  0xd0   : > { %5199 = vmatmul.mubr.msk.f32.gmra.mrb[24].mxu0 %vm223_vm1, %v6108_v51 }
  0xd1   : > { %5303 = vmatmul.mubr.msk.f32.gmra.mrb[24].mxu1 %vm223_vm1, %v5975_v28  ;;  %5201 = vmatprep.mubr.msk.f32.mxu0 %vm223_vm1, %v6111_v52 }
  0xd2   : > { %5305 = vmatprep.mubr.msk.f32.mxu1 %vm223_vm1, %v5981_v30 }
  0xd4   : > { %5202 = vmatmul.mubr.msk.f32.gmra.mrb[26].mxu0 %vm223_vm1, %v6122_v53 }
  0xd5   : > { %5306 = vmatmul.mubr.msk.f32.gmra.mrb[26].mxu1 %vm223_vm1, %v5995_v32  ;;  %5204 = vmatprep.mubr.msk.f32.mxu0 %vm223_vm1, %v6125_v54 }
  0xd6   : > { %5308 = vmatprep.mubr.msk.f32.mxu1 %vm223_vm1, %v6001_v34 }
  0xd8   : > { %5205 = vmatmul.mubr.msk.f32.gmra.mrb[28].mxu0 %vm223_vm1, %v6136_v55 }
  0xd9   : > { %5309 = vmatmul.mubr.msk.f32.gmra.mrb[28].mxu1 %vm223_vm1, %v6015_v36  ;;  %5207 = vmatprep.mubr.msk.f32.mxu0 %vm223_vm1, %v6205_v58 }
  0xda   : > { %5311 = vmatprep.mubr.msk.f32.mxu1 %vm223_vm1, %v6208_v59 }
  0xdc   : > { %5208 = vmatmul.mubr.msk.f32.gmra.mrb[30].mxu0 %vm223_vm1, %v6219_v60 }
  0xdd   : > { %5312 = vmatmul.mubr.msk.f32.gmra.mrb[30].mxu1 %vm223_vm1, %v6222_v61  ;;  %5212 = vmatprep.mubr.msk.f32.mxu0 %vm223_vm1, %v6053_v44 }
  0xde   : > { %5316 = vmatprep.mubr.msk.f32.mxu1 %vm223_vm1, %v5897_v14 }
  0xe0   : > { %5213 = vmatmul.mubr.msk.f32.vlgmr.msra.gmra.mrb[16].mxu0 %vm223_vm1, %v6066_v45 }
  0xe1   : > { %5317 = vmatmul.mubr.msk.f32.vlgmr.msra.gmra.mrb[16].mxu1 %vm223_vm1, %v5915_v16  ;;  %5237 = vmatpush3.msk.msra.mxu0 %vm272_vm0, %v4518_v4 }
  0xe2   : > { %5215 = vmatprep.mubr.msk.f32.mxu0 %vm223_vm1, %v6069_v46  ;;  %5319 = vmatprep.mubr.msk.f32.mxu1 %vm223_vm1, %v5921_v18 }
  0xe3   : > { %5341 = vmatpush3.msk.msra.mxu1 %vm272_vm0, %v4654_v5 }
  0xe4   : > { %5216 = vmatmul.mubr.msk.f32.gmra.mrb[18].mxu0 %vm223_vm1, %v6080_v47 }
  0xe5   : > { %5320 = vmatmul.mubr.msk.f32.gmra.mrb[18].mxu1 %vm223_vm1, %v5935_v20  ;;  %5218 = vmatprep.mubr.msk.f32.mxu0 %vm223_vm1, %v6083_v48 }
  0xe6   : > { %5322 = vmatprep.mubr.msk.f32.mxu1 %vm223_vm1, %v5941_v22 }
  0xe8   : > { %5219 = vmatmul.mubr.msk.f32.gmra.mrb[20].mxu0 %vm223_vm1, %v6094_v49 }
  0xe9   : > { %5323 = vmatmul.mubr.msk.f32.gmra.mrb[20].mxu1 %vm223_vm1, %v5955_v24  ;;  %5221 = vmatprep.mubr.msk.f32.mxu0 %vm223_vm1, %v6097_v50 }
  0xea   : > { %5325 = vmatprep.mubr.msk.f32.mxu1 %vm223_vm1, %v5961_v26 }
  0xec   : > { %5222 = vmatmul.mubr.msk.f32.gmra.mrb[22].mxu0 %vm223_vm1, %v6108_v51 }
  0xed   : > { %5326 = vmatmul.mubr.msk.f32.gmra.mrb[22].mxu1 %vm223_vm1, %v5975_v28  ;;  %5224 = vmatprep.mubr.msk.f32.mxu0 %vm223_vm1, %v6111_v52 }
  0xee   : > { %5328 = vmatprep.mubr.msk.f32.mxu1 %vm223_vm1, %v5981_v30 }
  0xf0   : > { %5225 = vmatmul.mubr.msk.f32.gmra.mrb[24].mxu0 %vm223_vm1, %v6122_v53 }
  0xf1   : > { %5329 = vmatmul.mubr.msk.f32.gmra.mrb[24].mxu1 %vm223_vm1, %v5995_v32  ;;  %5227 = vmatprep.mubr.msk.f32.mxu0 %vm223_vm1, %v6125_v54 }
  0xf2   : > { %5331 = vmatprep.mubr.msk.f32.mxu1 %vm223_vm1, %v6001_v34 }
  0xf4   : > { %5228 = vmatmul.mubr.msk.f32.gmra.mrb[26].mxu0 %vm223_vm1, %v6136_v55 }
  0xf5   : > { %5332 = vmatmul.mubr.msk.f32.gmra.mrb[26].mxu1 %vm223_vm1, %v6015_v36  ;;  %5230 = vmatprep.mubr.msk.f32.mxu0 %vm223_vm1, %v6205_v58 }
  0xf6   : > { %5334 = vmatprep.mubr.msk.f32.mxu1 %vm223_vm1, %v6208_v59 }
  0xf8   : > { %5231 = vmatmul.mubr.msk.f32.gmra.mrb[28].mxu0 %vm223_vm1, %v6219_v60 }
  0xf9   : > { %5335 = vmatmul.mubr.msk.f32.gmra.mrb[28].mxu1 %vm223_vm1, %v6222_v61  ;;  %5233 = vmatprep.mubr.msk.f32.mxu0 %vm223_vm1, %v4482_v6 }
  0xfa   : > { %5337 = vmatprep.mubr.msk.f32.mxu1 %vm223_vm1, %v4618_v7 }
  0xfc   : > { %5234 = vmatmul.mubr.msk.f32.gmra.mrb[30].mxu0 %vm223_vm1, %v4483_v8 }
  0xfd   : > { %5338 = vmatmul.mubr.msk.f32.gmra.mrb[30].mxu1 %vm223_vm1, %v4619_v9  ;;  %5238 = vmatprep.mubr.msk.f32.mxu0 %vm223_vm1, %v5897_v14 }
  0xfe   : > { %5342 = vmatprep.mubr.msk.f32.mxu1 %vm223_vm1, %v5900_v15 }
 0x100   : > { %5239 = vmatmul.mubr.msk.f32.vlgmr.msra.gmra.mrb[16].mxu0 %vm223_vm1, %v5915_v16 }
 0x101   : > { %5343 = vmatmul.mubr.msk.f32.vlgmr.msra.gmra.mrb[16].mxu1 %vm223_vm1, %v5918_v17  ;;  %5241 = vmatprep.mubr.msk.f32.mxu0 %vm223_vm1, %v5921_v18 }
 0x102   : > { %5345 = vmatprep.mubr.msk.f32.mxu1 %vm223_vm1, %v5924_v19 }
 0x104   : > { %5242 = vmatmul.mubr.msk.f32.gmra.mrb[18].mxu0 %vm223_vm1, %v5935_v20 }
 0x105   : > { %5346 = vmatmul.mubr.msk.f32.gmra.mrb[18].mxu1 %vm223_vm1, %v5938_v21  ;;  %5244 = vmatprep.mubr.msk.f32.mxu0 %vm223_vm1, %v5941_v22 }
 0x106   : > { %5348 = vmatprep.mubr.msk.f32.mxu1 %vm223_vm1, %v5944_v23 }
 0x108   : > { %5245 = vmatmul.mubr.msk.f32.gmra.mrb[20].mxu0 %vm223_vm1, %v5955_v24 }
 0x109   : > { %5349 = vmatmul.mubr.msk.f32.gmra.mrb[20].mxu1 %vm223_vm1, %v5958_v25  ;;  %5247 = vmatprep.mubr.msk.f32.mxu0 %vm223_vm1, %v5961_v26 }
 0x10a   : > { %5351 = vmatprep.mubr.msk.f32.mxu1 %vm223_vm1, %v5964_v27 }
 0x10c   : > { %5248 = vmatmul.mubr.msk.f32.gmra.mrb[22].mxu0 %vm223_vm1, %v5975_v28 }
 0x10d   : > { %5352 = vmatmul.mubr.msk.f32.gmra.mrb[22].mxu1 %vm223_vm1, %v5978_v29  ;;  %5250 = vmatprep.mubr.msk.f32.mxu0 %vm223_vm1, %v5981_v30 }
 0x10e   : > { %5354 = vmatprep.mubr.msk.f32.mxu1 %vm223_vm1, %v5984_v31 }
 0x110   : > { %5251 = vmatmul.mubr.msk.f32.gmra.mrb[24].mxu0 %vm223_vm1, %v5995_v32 }
 0x111   : > { %5355 = vmatmul.mubr.msk.f32.gmra.mrb[24].mxu1 %vm223_vm1, %v5998_v33  ;;  %5253 = vmatprep.mubr.msk.f32.mxu0 %vm223_vm1, %v6001_v34 }
 0x112   : > { %5357 = vmatprep.mubr.msk.f32.mxu1 %vm223_vm1, %v6004_v35 }
 0x114   : > { %5254 = vmatmul.mubr.msk.f32.gmra.mrb[26].mxu0 %vm223_vm1, %v6015_v36 }
 0x115   : > { %5358 = vmatmul.mubr.msk.f32.gmra.mrb[26].mxu1 %vm223_vm1, %v6018_v37  ;;  %5256 = vmatprep.mubr.msk.f32.mxu0 %vm223_vm1, %v6208_v59 }
 0x116   : > { %5360 = vmatprep.mubr.msk.f32.mxu1 %vm223_vm1, %v6291_v0 }
 0x118   : > { %5257 = vmatmul.mubr.msk.f32.gmra.mrb[28].mxu0 %vm223_vm1, %v6222_v61 }
 0x119   : > { %5361 = vmatmul.mubr.msk.f32.gmra.mrb[28].mxu1 %vm223_vm1, %v6302_v1  ;;  %5259 = vmatprep.mubr.msk.f32.mxu0 %vm223_vm1, %v4618_v7 }
 0x11a   : > { %5363 = vmatprep.mubr.msk.f32.mxu1 %vm223_vm1, %v4652_v10 }
 0x11c   : > { %5260 = vmatmul.mubr.msk.f32.gmra.mrb[30].mxu0 %vm223_vm1, %v4619_v9 }
 0x11d   : > { %5364 = vmatmul.mubr.msk.f32.gmra.mrb[30].mxu1 %vm223_vm1, %v4653_v11 }
 0x153   : > { %v5032_v13 = vpop.f32.mrb[0].mxu0 }
 0x154   : > { %v5136_v14 = vpop.f32.mrb[0].mxu1  ;;  %v1087_v15 = vadd.f32 %v5032_v13, %v6590_v12  ;;  %v985_v17 = vpop.f32.mrb[1].mxu0 }
 0x155   : > { %v2008_v16 = vadd.f32 %v5136_v14, %v6590_v12  ;;  %v1912_v18 = vpop.f32.mrb[1].mxu1  ;;  %v1086_v19 = vadd.f32 %v6590_v12, %v985_v17 }
 0x156   : > { %1104 = vst.msk [vmem:[%s6595_s4 + $0x8] sm:$0xff] %vm1102_vm2, %v1087_v15  ;;  %v2007_v22 = vadd.f32 %v6590_v12, %v1912_v18 }
 0x157   : > { %2041 = vrot.lane.b32.xlu0 %v2008_v16, %s5731_s7  ;;  %1103 = vst.msk [vmem:[%s6595_s4] sm:$0xff] %vm1102_vm2, %v1086_v19  ;;  %v5035_v20 = vpop.f32.mrb[2].mxu0 }
 0x158   : > { %v5139_v21 = vpop.f32.mrb[2].mxu1  ;;  %v1089_v23 = vadd.f32 %v5035_v20, %v6590_v12  ;;  %v995_v25 = vpop.f32.mrb[3].mxu0 }
 0x159   : > { %v2010_v24 = vadd.f32 %v5139_v21, %v6590_v12  ;;  %v1922_v26 = vpop.f32.mrb[3].mxu1  ;;  %v1088_v27 = vadd.f32 %v6590_v12, %v995_v25 }
 0x15a   : > { %1106 = vst.msk [vmem:[%s6595_s4 + $0x18] sm:$0xff] %vm1102_vm2, %v1089_v23  ;;  %v2009_v30 = vadd.f32 %v6590_v12, %v1922_v26 }
 0x15b   : > { %2039 = vrot.lane.b32.xlu0 %v2007_v22, %s5731_s7  ;;  %2045 = vrot.lane.b32.xlu1 %v2010_v24, %s5731_s7  ;;  %1105 = vst.msk [vmem:[%s6595_s4 + $0x10] sm:$0xff] %vm1102_vm2, %v1088_v27  ;;  %v5038_v28 = vpop.f32.mrb[4].mxu0 }
 0x15c   : > { %v5142_v29 = vpop.f32.mrb[4].mxu1  ;;  %v1091_v31 = vadd.f32 %v5038_v28, %v6590_v12  ;;  %v1005_v32 = vpop.f32.mrb[5].mxu0 }
 0x15d   : > { %v1932_v33 = vpop.f32.mrb[5].mxu1  ;;  %v1090_v34 = vadd.f32 %v6590_v12, %v1005_v32  ;;  %v2012_v38 = vadd.f32 %v5142_v29, %v6590_v12 }
 0x15e   : > { %v2011_v35 = vadd.f32 %v6590_v12, %v1932_v33  ;;  %1108 = vst.msk [vmem:[%s6595_s4 + $0x28] sm:$0xff] %vm1102_vm2, %v1091_v31 }
 0x15f   : > { %2043 = vrot.lane.b32.xlu1 %v2009_v30, %s5731_s7  ;;  %1107 = vst.msk [vmem:[%s6595_s4 + $0x20] sm:$0xff] %vm1102_vm2, %v1090_v34  ;;  %v5041_v36 = vpop.f32.mrb[6].mxu0 }
 0x160   : > { %2047 = vrot.lane.b32.xlu0 %v2011_v35, %s5731_s7  ;;  %v5145_v37 = vpop.f32.mrb[6].mxu1  ;;  %v1093_v39 = vadd.f32 %v5041_v36, %v6590_v12  ;;  %v1015_v40 = vpop.f32.mrb[7].mxu0 }
 0x161   : > { %v1942_v41 = vpop.f32.mrb[7].mxu1  ;;  %v1092_v42 = vadd.f32 %v6590_v12, %v1015_v40  ;;  %v2014_v46 = vadd.f32 %v5145_v37, %v6590_v12 }
 0x162   : > { %v2013_v43 = vadd.f32 %v6590_v12, %v1942_v41  ;;  %1110 = vst.msk [vmem:[%s6595_s4 + $0x38] sm:$0xff] %vm1102_vm2, %v1093_v39 }
 0x163   : > { %2049 = vrot.lane.b32.xlu1 %v2012_v38, %s5731_s7  ;;  %1109 = vst.msk [vmem:[%s6595_s4 + $0x30] sm:$0xff] %vm1102_vm2, %v1092_v42  ;;  %v5044_v44 = vpop.f32.mrb[8].mxu0 }
 0x164   : > { %2051 = vrot.lane.b32.xlu0 %v2013_v43, %s5731_s7  ;;  %v5148_v45 = vpop.f32.mrb[8].mxu1  ;;  %v1095_v47 = vadd.f32 %v5044_v44, %v6590_v12  ;;  %v1025_v48 = vpop.f32.mrb[9].mxu0 }
 0x165   : > { %v1952_v49 = vpop.f32.mrb[9].mxu1  ;;  %v1094_v50 = vadd.f32 %v6590_v12, %v1025_v48  ;;  %v2016_v54 = vadd.f32 %v5148_v45, %v6590_v12 }
 0x166   : > { %v2015_v51 = vadd.f32 %v6590_v12, %v1952_v49  ;;  %1112 = vst.msk [vmem:[%s6595_s4 + $0x48] sm:$0xff] %vm1102_vm2, %v1095_v47 }
 0x167   : > { %2053 = vrot.lane.b32.xlu1 %v2014_v46, %s5731_s7  ;;  %1111 = vst.msk [vmem:[%s6595_s4 + $0x40] sm:$0xff] %vm1102_vm2, %v1094_v50  ;;  %v5047_v52 = vpop.f32.mrb[10].mxu0 }
 0x168   : > { %2055 = vrot.lane.b32.xlu0 %v2015_v51, %s5731_s7  ;;  %v5151_v53 = vpop.f32.mrb[10].mxu1  ;;  %v1097_v55 = vadd.f32 %v5047_v52, %v6590_v12  ;;  %v1035_v56 = vpop.f32.mrb[11].mxu0 }
 0x169   : > { %v1962_v57 = vpop.f32.mrb[11].mxu1  ;;  %v1096_v58 = vadd.f32 %v6590_v12, %v1035_v56  ;;  %v2018_v62 = vadd.f32 %v5151_v53, %v6590_v12 }
 0x16a   : > { %v2017_v59 = vadd.f32 %v6590_v12, %v1962_v57  ;;  %1114 = vst.msk [vmem:[%s6595_s4 + $0x58] sm:$0xff] %vm1102_vm2, %v1097_v55 }
 0x16b   : > { %2057 = vrot.lane.b32.xlu1 %v2016_v54, %s5731_s7  ;;  %1113 = vst.msk [vmem:[%s6595_s4 + $0x50] sm:$0xff] %vm1102_vm2, %v1096_v58  ;;  %v5050_v60 = vpop.f32.mrb[12].mxu0 }
 0x16c   : > { %2059 = vrot.lane.b32.xlu0 %v2017_v59, %s5731_s7  ;;  %v5154_v61 = vpop.f32.mrb[12].mxu1  ;;  %v1099_v63 = vadd.f32 %v5050_v60, %v6590_v12  ;;  %v1045_v0 = vpop.f32.mrb[13].mxu0 }
 0x16d   : > { %v1972_v1 = vpop.f32.mrb[13].mxu1  ;;  %v1098_v2 = vadd.f32 %v6590_v12, %v1045_v0  ;;  %v2020_v6 = vadd.f32 %v5154_v61, %v6590_v12 }
 0x16e   : > { %v2019_v3 = vadd.f32 %v6590_v12, %v1972_v1  ;;  %1116 = vst.msk [vmem:[%s6595_s4 + $0x68] sm:$0xff] %vm1102_vm2, %v1099_v63 }
 0x16f   : > { %2061 = vrot.lane.b32.xlu1 %v2018_v62, %s5731_s7  ;;  %1115 = vst.msk [vmem:[%s6595_s4 + $0x60] sm:$0xff] %vm1102_vm2, %v1098_v2  ;;  %v5053_v4 = vpop.f32.mrb[14].mxu0 }
 0x170   : > { %2063 = vrot.lane.b32.xlu0 %v2019_v3, %s5731_s7  ;;  %v5157_v5 = vpop.f32.mrb[14].mxu1  ;;  %v1101_v7 = vadd.f32 %v5053_v4, %v6590_v12  ;;  %v1055_v8 = vpop.f32.mrb[15].mxu0 }
 0x171   : > { %v1982_v9 = vpop.f32.mrb[15].mxu1  ;;  %v1100_v10 = vadd.f32 %v6590_v12, %v1055_v8  ;;  %v2022_v13 = vadd.f32 %v5157_v5, %v6590_v12 }
 0x172   : > { %v2021_v11 = vadd.f32 %v6590_v12, %v1982_v9  ;;  %1118 = vst.msk [vmem:[%s6595_s4 + $0x78] sm:$0xff] %vm1102_vm2, %v1101_v7 }
 0x173   : > { %2065 = vrot.lane.b32.xlu1 %v2020_v6, %s5731_s7  ;;  %1117 = vst.msk [vmem:[%s6595_s4 + $0x70] sm:$0xff] %vm1102_vm2, %v1100_v10 }
 0x174   : > { %2067 = vrot.lane.b32.xlu0 %v2021_v11, %s5731_s7 }
 0x177   : > { %2069 = vrot.lane.b32.xlu1 %v2022_v13, %s5731_s7  ;;  %s5639_s7 = sshll.u32 %s5734_s6, 4  ;;  %s5640_s7 = int_to_ptr.vmem [resolvable:$false] %s5639_s7 }
 0x178   : > { %p5642_p2 = scmp.lt.s32.totalorder %s6838_s24, %s5640_s7 }
 0x1c9   : > { %v2042_v14 = vpop.permute.xlu0 %2041 }
 0x1ca   : > { %2089 = vst.msk [vmem:[%s6595_s4 + $0x8] sm:$0xff] %vm2087_vm3, %v2042_v14 }
 0x1cd   : > { %v2040_v15 = vpop.permute.xlu0 %2039  ;;  %v2046_v16 = vpop.permute.xlu1 %2045 }
 0x1ce   : > { %2088 = vst.msk [vmem:[%s6595_s4] sm:$0xff] %vm2087_vm3, %v2040_v15  ;;  %2091 = vst.msk [vmem:[%s6595_s4 + $0x18] sm:$0xff] %vm2087_vm3, %v2046_v16 }
 0x1d1   : > { %v2044_v17 = vpop.permute.xlu1 %2043 }
 0x1d2   : > { %2090 = vst.msk [vmem:[%s6595_s4 + $0x10] sm:$0xff] %vm2087_vm3, %v2044_v17  ;;  %v2048_v18 = vpop.permute.xlu0 %2047 }
 0x1d3   : > { %2092 = vst.msk [vmem:[%s6595_s4 + $0x20] sm:$0xff] %vm2087_vm3, %v2048_v18  ;;  %v5240_v19 = vpop.f32.mrb[16].mxu0 }
 0x1d4   : > { %v5344_v20 = vpop.f32.mrb[16].mxu1  ;;  %v2996_v21 = vadd.f32 %v5240_v19, %v6590_v12  ;;  %v2900_v23 = vpop.f32.mrb[17].mxu0 }
 0x1d5   : > { %v2050_v22 = vpop.permute.xlu1 %2049  ;;  %v2995_v24 = vadd.f32 %v6590_v12, %v2900_v23  ;;  %v3885_v25 = vpop.f32.mrb[17].mxu1  ;;  %v3981_v29 = vadd.f32 %v5344_v20, %v6590_v12 }
 0x1d6   : > { %2093 = vst.msk [vmem:[%s6595_s4 + $0x28] sm:$0xff] %vm2087_vm3, %v2050_v22  ;;  %v2052_v26 = vpop.permute.xlu0 %2051  ;;  %3029 = vrot.lane.b32.xlu1 %v2996_v21, %s5732_s8  ;;  %v3980_v32 = vadd.f32 %v6590_v12, %v3885_v25 }
 0x1d7   : > { %2094 = vst.msk [vmem:[%s6595_s4 + $0x30] sm:$0xff] %vm2087_vm3, %v2052_v26  ;;  %3027 = vrot.lane.b32.xlu0 %v2995_v24, %s5732_s8  ;;  %v5243_v28 = vpop.f32.mrb[18].mxu0 }
 0x1d8   : > { %v5347_v27 = vpop.f32.mrb[18].mxu1  ;;  %v2910_v31 = vpop.f32.mrb[19].mxu0  ;;  %v2998_v37 = vadd.f32 %v5243_v28, %v6590_v12 }
 0x1d9   : > { %v2054_v30 = vpop.permute.xlu1 %2053  ;;  %v3895_v33 = vpop.f32.mrb[19].mxu1  ;;  %v2997_v40 = vadd.f32 %v6590_v12, %v2910_v31  ;;  %v3983_v45 = vadd.f32 %v5347_v27, %v6590_v12 }
 0x1da   : > { %2095 = vst.msk [vmem:[%s6595_s4 + $0x38] sm:$0xff] %vm2087_vm3, %v2054_v30  ;;  %v2056_v34 = vpop.permute.xlu0 %2055  ;;  %4014 = vrot.lane.b32.xlu1 %v3981_v29, %s5733_s9  ;;  %v3982_v48 = vadd.f32 %v6590_v12, %v3895_v33 }
 0x1db   : > { %2096 = vst.msk [vmem:[%s6595_s4 + $0x40] sm:$0xff] %vm2087_vm3, %v2056_v34  ;;  %4012 = vrot.lane.b32.xlu0 %v3980_v32, %s5733_s9  ;;  %v5246_v36 = vpop.f32.mrb[20].mxu0 }
 0x1dc   : > { %v5350_v35 = vpop.f32.mrb[20].mxu1  ;;  %v2920_v39 = vpop.f32.mrb[21].mxu0  ;;  %v3000_v53 = vadd.f32 %v5246_v36, %v6590_v12 }
 0x1dd   : > { %v2058_v38 = vpop.permute.xlu1 %2057  ;;  %v3905_v41 = vpop.f32.mrb[21].mxu1  ;;  %v2999_v56 = vadd.f32 %v6590_v12, %v2920_v39  ;;  %v3985_v61 = vadd.f32 %v5350_v35, %v6590_v12 }
 0x1de   : > { %2097 = vst.msk [vmem:[%s6595_s4 + $0x48] sm:$0xff] %vm2087_vm3, %v2058_v38  ;;  %v2060_v42 = vpop.permute.xlu0 %2059  ;;  %3033 = vrot.lane.b32.xlu1 %v2998_v37, %s5732_s8  ;;  %v3984_v0 = vadd.f32 %v6590_v12, %v3905_v41 }
 0x1df   : > { %2098 = vst.msk [vmem:[%s6595_s4 + $0x50] sm:$0xff] %vm2087_vm3, %v2060_v42  ;;  %3031 = vrot.lane.b32.xlu0 %v2997_v40, %s5732_s8  ;;  %v5249_v44 = vpop.f32.mrb[22].mxu0 }
 0x1e0   : > { %v5353_v43 = vpop.f32.mrb[22].mxu1  ;;  %v2930_v47 = vpop.f32.mrb[23].mxu0  ;;  %v3002_v4 = vadd.f32 %v5249_v44, %v6590_v12 }
 0x1e1   : > { %v2062_v46 = vpop.permute.xlu1 %2061  ;;  %v3915_v49 = vpop.f32.mrb[23].mxu1  ;;  %v3001_v7 = vadd.f32 %v6590_v12, %v2930_v47  ;;  %v3987_v10 = vadd.f32 %v5353_v43, %v6590_v12 }
 0x1e2   : > { %2099 = vst.msk [vmem:[%s6595_s4 + $0x58] sm:$0xff] %vm2087_vm3, %v2062_v46  ;;  %v2064_v50 = vpop.permute.xlu0 %2063  ;;  %4018 = vrot.lane.b32.xlu1 %v3983_v45, %s5733_s9  ;;  %v3986_v14 = vadd.f32 %v6590_v12, %v3915_v49 }
 0x1e3   : > { %2100 = vst.msk [vmem:[%s6595_s4 + $0x60] sm:$0xff] %vm2087_vm3, %v2064_v50  ;;  %4016 = vrot.lane.b32.xlu0 %v3982_v48, %s5733_s9  ;;  %v5252_v52 = vpop.f32.mrb[24].mxu0 }
 0x1e4   : > { %v5356_v51 = vpop.f32.mrb[24].mxu1  ;;  %v2940_v55 = vpop.f32.mrb[25].mxu0  ;;  %v3004_v15 = vadd.f32 %v5252_v52, %v6590_v12 }
 0x1e5   : > { %v2066_v54 = vpop.permute.xlu1 %2065  ;;  %v3925_v57 = vpop.f32.mrb[25].mxu1  ;;  %v3003_v16 = vadd.f32 %v6590_v12, %v2940_v55  ;;  %v3989_v17 = vadd.f32 %v5356_v51, %v6590_v12 }
 0x1e6   : > { %2101 = vst.msk [vmem:[%s6595_s4 + $0x68] sm:$0xff] %vm2087_vm3, %v2066_v54  ;;  %v2068_v58 = vpop.permute.xlu0 %2067  ;;  %3037 = vrot.lane.b32.xlu1 %v3000_v53, %s5732_s8  ;;  %v3988_v18 = vadd.f32 %v6590_v12, %v3925_v57 }
 0x1e7   : > { %2102 = vst.msk [vmem:[%s6595_s4 + $0x70] sm:$0xff] %vm2087_vm3, %v2068_v58  ;;  %3035 = vrot.lane.b32.xlu0 %v2999_v56, %s5732_s8  ;;  %v5255_v60 = vpop.f32.mrb[26].mxu0 }
 0x1e8   : > { %v5359_v59 = vpop.f32.mrb[26].mxu1  ;;  %v2950_v63 = vpop.f32.mrb[27].mxu0  ;;  %v3006_v19 = vadd.f32 %v5255_v60, %v6590_v12 }
 0x1e9   : > { %v2070_v62 = vpop.permute.xlu1 %2069  ;;  %v3935_v1 = vpop.f32.mrb[27].mxu1  ;;  %v3005_v20 = vadd.f32 %v6590_v12, %v2950_v63  ;;  %v3991_v21 = vadd.f32 %v5359_v59, %v6590_v12 }
 0x1ea   : > { %2103 = vst.msk [vmem:[%s6595_s4 + $0x78] sm:$0xff] %vm2087_vm3, %v2070_v62  ;;  %4022 = vrot.lane.b32.xlu1 %v3985_v61, %s5733_s9  ;;  %v3990_v22 = vadd.f32 %v6590_v12, %v3935_v1 }
 0x1eb   : > { %4020 = vrot.lane.b32.xlu0 %v3984_v0, %s5733_s9  ;;  %v5258_v3 = vpop.f32.mrb[28].mxu0 }
 0x1ec   : > { %v5362_v2 = vpop.f32.mrb[28].mxu1  ;;  %v2960_v5 = vpop.f32.mrb[29].mxu0  ;;  %v3008_v23 = vadd.f32 %v5258_v3, %v6590_v12 }
 0x1ed   : > { %v3945_v6 = vpop.f32.mrb[29].mxu1  ;;  %v3007_v24 = vadd.f32 %v6590_v12, %v2960_v5  ;;  %v3993_v25 = vadd.f32 %v5362_v2, %v6590_v12 }
 0x1ee   : > { %3041 = vrot.lane.b32.xlu1 %v3002_v4, %s5732_s8  ;;  %v3992_v26 = vadd.f32 %v6590_v12, %v3945_v6 }
 0x1ef   : > { %3039 = vrot.lane.b32.xlu0 %v3001_v7, %s5732_s8  ;;  %v5261_v9 = vpop.f32.mrb[30].mxu0 }
 0x1f0   : > { %v5365_v8 = vpop.f32.mrb[30].mxu1  ;;  %v2970_v11 = vpop.f32.mrb[31].mxu0  ;;  %v3010_v27 = vadd.f32 %v5261_v9, %v6590_v12 }
 0x1f1   : > { %v3955_v13 = vpop.f32.mrb[31].mxu1  ;;  %v3009_v28 = vadd.f32 %v6590_v12, %v2970_v11  ;;  %v3995_v29 = vadd.f32 %v5365_v8, %v6590_v12 }
 0x1f2   : > { %4026 = vrot.lane.b32.xlu1 %v3987_v10, %s5733_s9  ;;  %v3994_v30 = vadd.f32 %v6590_v12, %v3955_v13 }
 0x1f3   : > { %4024 = vrot.lane.b32.xlu0 %v3986_v14, %s5733_s9 }
 0x1f6   : > { %3045 = vrot.lane.b32.xlu1 %v3004_v15, %s5732_s8 }
 0x1f7   : > { %3043 = vrot.lane.b32.xlu0 %v3003_v16, %s5732_s8 }
 0x1fa   : > { %4030 = vrot.lane.b32.xlu1 %v3989_v17, %s5733_s9 }
 0x1fb   : > { %4028 = vrot.lane.b32.xlu0 %v3988_v18, %s5733_s9 }
 0x1fe   : > { %3049 = vrot.lane.b32.xlu1 %v3006_v19, %s5732_s8 }
 0x1ff   : > { %3047 = vrot.lane.b32.xlu0 %v3005_v20, %s5732_s8 }
 0x202   : > { %4034 = vrot.lane.b32.xlu1 %v3991_v21, %s5733_s9 }
 0x203   : > { %4032 = vrot.lane.b32.xlu0 %v3990_v22, %s5733_s9 }
 0x206   : > { %3053 = vrot.lane.b32.xlu1 %v3008_v23, %s5732_s8 }
 0x207   : > { %3051 = vrot.lane.b32.xlu0 %v3007_v24, %s5732_s8 }
 0x20a   : > { %4038 = vrot.lane.b32.xlu1 %v3993_v25, %s5733_s9 }
 0x20b   : > { %4036 = vrot.lane.b32.xlu0 %v3992_v26, %s5733_s9 }
 0x20e   : > { %3057 = vrot.lane.b32.xlu1 %v3010_v27, %s5732_s8 }
 0x20f   : > { %3055 = vrot.lane.b32.xlu0 %v3009_v28, %s5732_s8  ;;  %s5641_s8 = scalar_lea.vmem %s5640_s7, 4096 }
 0x210   : > { %p5643_p4 = scmp.lt.s32.totalorder %s5641_s8, %s5635_s5 }
 0x212   : > { %4042 = vrot.lane.b32.xlu1 %v3995_v29, %s5733_s9  ;;  %p5644_p5 = por %p5643_p4, %p5642_p2 }
 0x213   : > { %4040 = vrot.lane.b32.xlu0 %v3994_v30, %s5733_s9 }
 0x214   : > { %p5645_p6 = pnand %p5644_p5, %p5638_p1 }
 0x248   : > { %v3030_v31 = vpop.permute.xlu1 %3029 }
 0x249   : > { %3077 = vst.msk [vmem:[%s6595_s4 + $0x8] sm:$0xff] %vm3075_vm4, %v3030_v31  ;;  %v3028_v32 = vpop.permute.xlu0 %3027 }
 0x24a   : > { %3076 = vst.msk [vmem:[%s6595_s4] sm:$0xff] %vm3075_vm4, %v3028_v32 }
 0x24c   : > { %v4015_v33 = vpop.permute.xlu1 %4014 }
 0x24d   : > { %4062 = vst.msk [vmem:[%s6595_s4 + $0x8] sm:$0xff] %vm4060_vm5, %v4015_v33  ;;  %v4013_v12 = vpop.permute.xlu0 %4012 }
 0x24e   : > { %4061 = vst.msk [vmem:[%s6595_s4] sm:$0xff] %vm4060_vm5, %v4013_v12 }
 0x250   : > { %v3034_v34 = vpop.permute.xlu1 %3033 }
 0x251   : > { %3079 = vst.msk [vmem:[%s6595_s4 + $0x18] sm:$0xff] %vm3075_vm4, %v3034_v34  ;;  %v3032_v35 = vpop.permute.xlu0 %3031 }
 0x252   : > { %3078 = vst.msk [vmem:[%s6595_s4 + $0x10] sm:$0xff] %vm3075_vm4, %v3032_v35 }
 0x254   : > { %v4019_v36 = vpop.permute.xlu1 %4018 }
 0x255   : > { %4064 = vst.msk [vmem:[%s6595_s4 + $0x18] sm:$0xff] %vm4060_vm5, %v4019_v36  ;;  %v4017_v37 = vpop.permute.xlu0 %4016 }
 0x256   : > { %4063 = vst.msk [vmem:[%s6595_s4 + $0x10] sm:$0xff] %vm4060_vm5, %v4017_v37 }
 0x258   : > { %v3038_v38 = vpop.permute.xlu1 %3037 }
 0x259   : > { %3081 = vst.msk [vmem:[%s6595_s4 + $0x28] sm:$0xff] %vm3075_vm4, %v3038_v38  ;;  %v3036_v39 = vpop.permute.xlu0 %3035 }
 0x25a   : > { %3080 = vst.msk [vmem:[%s6595_s4 + $0x20] sm:$0xff] %vm3075_vm4, %v3036_v39 }
 0x25c   : > { %v4023_v40 = vpop.permute.xlu1 %4022 }
 0x25d   : > { %4066 = vst.msk [vmem:[%s6595_s4 + $0x28] sm:$0xff] %vm4060_vm5, %v4023_v40  ;;  %v4021_v41 = vpop.permute.xlu0 %4020 }
 0x25e   : > { %4065 = vst.msk [vmem:[%s6595_s4 + $0x20] sm:$0xff] %vm4060_vm5, %v4021_v41 }
 0x260   : > { %v3042_v42 = vpop.permute.xlu1 %3041 }
 0x261   : > { %3083 = vst.msk [vmem:[%s6595_s4 + $0x38] sm:$0xff] %vm3075_vm4, %v3042_v42  ;;  %v3040_v43 = vpop.permute.xlu0 %3039 }
 0x262   : > { %3082 = vst.msk [vmem:[%s6595_s4 + $0x30] sm:$0xff] %vm3075_vm4, %v3040_v43 }
 0x264   : > { %v4027_v44 = vpop.permute.xlu1 %4026 }
 0x265   : > { %4068 = vst.msk [vmem:[%s6595_s4 + $0x38] sm:$0xff] %vm4060_vm5, %v4027_v44  ;;  %v4025_v45 = vpop.permute.xlu0 %4024 }
 0x266   : > { %4067 = vst.msk [vmem:[%s6595_s4 + $0x30] sm:$0xff] %vm4060_vm5, %v4025_v45 }
 0x268   : > { %v3046_v46 = vpop.permute.xlu1 %3045 }
 0x269   : > { %3085 = vst.msk [vmem:[%s6595_s4 + $0x48] sm:$0xff] %vm3075_vm4, %v3046_v46  ;;  %v3044_v47 = vpop.permute.xlu0 %3043 }
 0x26a   : > { %3084 = vst.msk [vmem:[%s6595_s4 + $0x40] sm:$0xff] %vm3075_vm4, %v3044_v47 }
 0x26c   : > { %v4031_v48 = vpop.permute.xlu1 %4030 }
 0x26d   : > { %4070 = vst.msk [vmem:[%s6595_s4 + $0x48] sm:$0xff] %vm4060_vm5, %v4031_v48  ;;  %v4029_v49 = vpop.permute.xlu0 %4028 }
 0x26e   : > { %4069 = vst.msk [vmem:[%s6595_s4 + $0x40] sm:$0xff] %vm4060_vm5, %v4029_v49 }
 0x270   : > { %v3050_v50 = vpop.permute.xlu1 %3049 }
 0x271   : > { %3087 = vst.msk [vmem:[%s6595_s4 + $0x58] sm:$0xff] %vm3075_vm4, %v3050_v50  ;;  %v3048_v51 = vpop.permute.xlu0 %3047 }
 0x272   : > { %3086 = vst.msk [vmem:[%s6595_s4 + $0x50] sm:$0xff] %vm3075_vm4, %v3048_v51 }
 0x274   : > { %v4035_v52 = vpop.permute.xlu1 %4034 }
 0x275   : > { %4072 = vst.msk [vmem:[%s6595_s4 + $0x58] sm:$0xff] %vm4060_vm5, %v4035_v52  ;;  %v4033_v53 = vpop.permute.xlu0 %4032 }
 0x276   : > { %4071 = vst.msk [vmem:[%s6595_s4 + $0x50] sm:$0xff] %vm4060_vm5, %v4033_v53 }
 0x278   : > { %v3054_v54 = vpop.permute.xlu1 %3053 }
 0x279   : > { %3089 = vst.msk [vmem:[%s6595_s4 + $0x68] sm:$0xff] %vm3075_vm4, %v3054_v54  ;;  %v3052_v55 = vpop.permute.xlu0 %3051 }
 0x27a   : > { %3088 = vst.msk [vmem:[%s6595_s4 + $0x60] sm:$0xff] %vm3075_vm4, %v3052_v55 }
 0x27c   : > { %v4039_v56 = vpop.permute.xlu1 %4038 }
 0x27d   : > { %4074 = vst.msk [vmem:[%s6595_s4 + $0x68] sm:$0xff] %vm4060_vm5, %v4039_v56  ;;  %v4037_v57 = vpop.permute.xlu0 %4036 }
 0x27e   : > { %4073 = vst.msk [vmem:[%s6595_s4 + $0x60] sm:$0xff] %vm4060_vm5, %v4037_v57 }
 0x280   : > { %v3058_v58 = vpop.permute.xlu1 %3057 }
 0x281   : > { %3091 = vst.msk [vmem:[%s6595_s4 + $0x78] sm:$0xff] %vm3075_vm4, %v3058_v58  ;;  %v3056_v59 = vpop.permute.xlu0 %3055 }
 0x282   : > { %3090 = vst.msk [vmem:[%s6595_s4 + $0x70] sm:$0xff] %vm3075_vm4, %v3056_v59 }
 0x284   : > { %v4043_v60 = vpop.permute.xlu1 %4042 }
 0x285   : > { %4076 = vst.msk [vmem:[%s6595_s4 + $0x78] sm:$0xff] %vm4060_vm5, %v4043_v60  ;;  %v4041_v61 = vpop.permute.xlu0 %4040 }
 0x286   : > { %4075 = vst.msk [vmem:[%s6595_s4 + $0x70] sm:$0xff] %vm4060_vm5, %v4041_v61 }
 0x287   : > { %5648 = shalt.err (!%p5645_p6)
}
 0x288   : > { %s5649_s28 = scalar_lea.hbm %s6836_s27, 2048  ;;  %s5653_s10 = scalar_lea.hbm %s6901_s3, 8192 }
 0x289   : > { %p5650_p7 = scmp.ne.s32.totalorder %s6836_s27, %s5649_s28  ;;  %p5654_p11 = scmp.lt.u32.totalorder %s6836_s27, %s6901_s3 }
 0x28a   : > { %p5655_p12 = scmp.lt.u32.totalorder %s5653_s10, %s5649_s28  ;;  %p5657_p0 = scmp.lt.u32.totalorder %s5649_s28, %s6836_s27 }
 0x28b   : > { %p5651_p9 = pnand %p5650_p7, %p5808_p3 }
 0x28c   : > { %p5656_p13 = por %p5655_p12, %p5654_p11 }
 0x28d   : > { %p5652_p10 = pneg %p5651_p9 }
 0x28e   : > { %p5658_p1 = por %p5657_p0, %p5656_p13 }
 0x290   : > { %p5659_p2 = pnand %p5658_p1, %p5652_p10 }
 0x292   : > { %5662 = shalt.err (!%p5659_p2)
}
 0x293   : > { %s5735_s21 = smov 128   ;;  %s5736_s15 = smov 8  }
 0x294   : > { %5559 = dma.vmem_to_hbm [thread:$0]  (%p5808_p3), %s6838_s24, 2048, %s6836_s27, %s6846_s29, %s5735_s21, %s5735_s21, %s5736_s15  }
 0x295 PF: > { %p5565_p4 = scmp.ge.s32.totalorder %s5729_s19, 2  ;;  %s4108_s16 = sand.u32 1, %s5701_s12  }
 0x296   : > { %s4109_s5 = scalar_lea.sflag [#allocation3], %s4108_s16 }
 0x297   : > { %p5562_p5 = pnand %p5565_p4, %p5817_p8 }
 0x299   : > { %5696 = dma.done.wait (!%p5562_p5), %s4109_s5, 2048  }
 0x29a   : > { %5698 = vsyncadd (!%p5562_p5), %s4109_s5, 4294965248  ;;  %s16_s19 = sadd.s32 1, %s5729_s19   ;;  %s6904_s12 = smov %s5705_s13 }
 0x29b   : > { %p13_p6 = scmp.ge.s32.totalorder %s16_s19, 6   ;;  %s6905_s13 = smov %s5709_s14 }
 0x29c   : > { %s6906_s14 = smov %s5826_s30  ;;  %s6907_s15 = smov %s5721_s17 }
 0x29d   : > { %s6908_s16 = smov %s5725_s18  ;;  %s6909_s17 = smov %s6912_s22 }
 0x29e   : > { %s6910_s18 = smov %s6916_s23  ;;  %15 = sbr.rel (!%p13_p6) target bundleno = 5 (0x5), region = 85 }
 0x2a5   :  { %4114 = vsyncpa [#allocation3], 1 }
 0x2a6   :  { %4116 = vsyncpa [#allocation3 + $0x1], 1 }

</bundles_post_ra>
